<compile_context>
chip_gen: v7x
topology: tpu7x:2x2x1
jax: 0.10.0
libtpu: 0.0.40
codegen_flags: <defaults>
</compile_context>

<pallas_src>
import functools
import numpy as np
import jax
import jax.numpy as jnp
from jax import lax
from jax.experimental import pallas as pl
from jax.experimental.pallas import tpu as pltpu


def _lowbias32(x):
    """Integer avalanche hash (lowbias32) on a uint32 array; good for counter inputs."""
    x = x ^ (x >> 16)
    x = x * jnp.uint32(0x7FEB352D)
    x = x ^ (x >> 15)
    x = x * jnp.uint32(0x846CA68B)
    x = x ^ (x >> 16)
    return x


def _dequant_fwd_kernel(seed_ref, z_ref, z_out_ref, ldj_ref, *,
                        alpha, quants, d_true, d_pad, mask_cols):
    b = pl.program_id(0)          # batch-tile index  ("parallel")
    d = pl.program_id(1)          # feature-tile index ("arbitrary" -> ldj reduction axis)
    tb, td = z_ref.shape

    # ---- counter-based uniform noise in [0, 1): portable & tiling-invariant ----------
    row = lax.broadcasted_iota(jnp.int32, (tb, td), 0) + b * tb        # global row
    col = lax.broadcasted_iota(jnp.int32, (tb, td), 1) + d * td        # global col
    ctr = row.astype(jnp.uint32) * jnp.uint32(d_pad) + col.astype(jnp.uint32)
    ctr = ctr + seed_ref[0].astype(jnp.uint32)                         # seed >= 0
    bits = _lowbias32(ctr)
    # top 24 bits -> [0, 1); (2^24-1)/2^24 is exact in f32, never rounds to 1.0
    u = (bits >> 8).astype(jnp.int32).astype(jnp.float32) * jnp.float32(1.0 / (1 << 24))

    # ---- dequant: float(z) + U[0,1), divide by quants --------------------------------
    zi = z_ref[...].astype(jnp.int32).astype(jnp.float32)
    z = (zi + u) * jnp.float32(1.0 / quants)

    # ---- inverse sigmoid (logit) with alpha scaling -----------------------------------
    z = z * jnp.float32(1.0 - alpha) + jnp.float32(0.5 * alpha)
    logz = jnp.log(z)
    log1mz = jnp.log(1.0 - z)

    z_out_ref[...] = logz - log1mz

    # ---- per-row data-dependent ldj: sum(-log z - log(1-z)) over this feature tile ----
    contrib = -logz - log1mz
    if mask_cols:  # only emitted when D was padded up to a multiple of 128
        contrib = jnp.where(col < d_true, contrib, jnp.float32(0.0))
    part = jnp.sum(contrib, axis=-1, keepdims=True)                    # (tb, 1)

    @pl.when(d == 0)
    def _():
        ldj_ref[...] = jnp.zeros_like(ldj_ref)
    ldj_ref[...] += part


def _choose_tiles(B, D_pad, max_tile_elems=512 * 1024):
    """Pick (TB, TD): TB multiple of 32 (uint8 packing), TD multiple of 128 dividing D_pad,
    with TB*TD capped so double-buffered in(u8)+out(f32) tiles stay well under VMEM limits."""
    max_td = max(128, (max_tile_elems // 32) // 128 * 128)
    if D_pad <= max_td:
        td = D_pad
    else:
        td = next(t for t in range(max_td, 0, -128) if D_pad % t == 0)
    b_align = ((B + 31) // 32) * 32
    tb = 32
    while tb * 2 <= b_align and (tb * 2) * td <= max_tile_elems:
        tb *= 2
    return tb, td


def dequantization_forward(z, ldj, *, alpha=1e-5, quants=256, seed=0):
    """Equivalent of Dequantization.forward(z, ldj, reverse=False). seed must be >= 0."""
    orig_shape = z.shape
    B = orig_shape[0]
    D = int(np.prod(orig_shape[1:]))

    # Keep the discrete input at 1 byte/element when possible (values are 0..quants-1).
    store_dtype = jnp.uint8 if quants <= 256 else jnp.int32
    z_flat = z.reshape(B, D)
    if z_flat.dtype != store_dtype:
        z_flat = z_flat.astype(store_dtype)

    D_pad = ((D + 127) // 128) * 128
    TB, TD = _choose_tiles(B, D_pad)
    B_pad = ((B + TB - 1) // TB) * TB
    if B_pad != B or D_pad != D:
        z_flat = jnp.pad(z_flat, ((0, B_pad - B), (0, D_pad - D)))

    seed_arr = jnp.array([seed], dtype=jnp.int32)
    kernel = functools.partial(
        _dequant_fwd_kernel,
        alpha=float(alpha), quants=int(quants),
        d_true=D, d_pad=D_pad, mask_cols=(D_pad != D))

    grid = (B_pad // TB, D_pad // TD)

    z_out_flat, ldj_sum = pl.pallas_call(
        kernel,
        out_shape=(
            jax.ShapeDtypeStruct((B_pad, D_pad), jnp.float32),
            jax.ShapeDtypeStruct((B_pad, 1), jnp.float32),   # per-row data-dependent ldj
        ),
        grid_spec=pltpu.PrefetchScalarGridSpec(
            num_scalar_prefetch=1,                            # seed lands in SMEM
            grid=grid,
            in_specs=[pl.BlockSpec((TB, TD), lambda b, d, seed: (b, d))],
            out_specs=[
                pl.BlockSpec((TB, TD), lambda b, d, seed: (b, d)),
                pl.BlockSpec((TB, 1), lambda b, d, seed: (b, 0)),   # resident across d
            ],
        ),
        compiler_params=pltpu.CompilerParams(
            dimension_semantics=("parallel", "arbitrary"),    # batch across TCs, reduce D
            vmem_limit_bytes=32 * 1024 * 1024,                # safe on v5e/v6e/v7x
        ),
    )(seed_arr, z_flat)

    # constant (data-independent) ldj terms added in glue code
    const = (-np.log(quants) + np.log(1.0 - alpha)) * D
    ldj_out = ldj.astype(jnp.float32) + jnp.float32(const) + ldj_sum[:B, 0]
    z_out = z_out_flat[:B, :D].reshape(orig_shape)
    return z_out, ldj_out


if __name__ == "__main__":
    key = jax.random.PRNGKey(0)
    B, C, H, W = 2, 4, 16, 16
    # discrete 8-bit-style image input, NCHW, kept at 1 byte/element
    z = jax.random.randint(key, (B, C, H, W), 0, 256, dtype=jnp.int32).astype(jnp.uint8)
    ldj = jnp.zeros((B,), dtype=jnp.float32)

    z_out, ldj_out = dequantization_forward(z, ldj, alpha=1e-5, quants=256, seed=0)
    z_out = jax.block_until_ready(z_out)
    ldj_out = jax.block_until_ready(ldj_out)

    assert z_out.shape == (B, C, H, W) and z_out.dtype == jnp.float32
    assert ldj_out.shape == (B,) and ldj_out.dtype == jnp.float32
    assert bool(jnp.all(jnp.isfinite(z_out))) and bool(jnp.all(jnp.isfinite(ldj_out)))

    # consistency check: ldj is a deterministic function of the returned z
    # (ldj = sum(-log s - log(1-s)) with s = sigmoid(z_out), plus constant terms)
    s = jax.nn.sigmoid(z_out.reshape(B, -1))
    D = C * H * W
    ldj_check = (jnp.sum(-jnp.log(s) - jnp.log(1.0 - s), axis=1)
                 + jnp.float32((np.log(1.0 - 1e-5) - np.log(256.0)) * D))
    assert bool(jnp.allclose(ldj_out, ldj_check, rtol=1e-3, atol=5.0))

    print("KERNEL_OK")
</pallas_src>

<mosaic_0001>
module attributes {stable_mosaic.version = 11 : i64} {
  func.func @_dequant_fwd_kernel(%arg0: i32, %arg1: i32, %arg2: memref<1xi32, #tpu.memory_space<smem>>, %arg3: memref<32x1024xi8, #tpu.memory_space<vmem>>, %arg4: memref<32x1024xf32, #tpu.memory_space<vmem>>, %arg5: memref<32x1xf32, #tpu.memory_space<vmem>>) attributes {dimension_semantics = [#tpu.dimension_semantics<parallel>, #tpu.dimension_semantics<arbitrary>], iteration_bounds = array<i64: 1, 1>, scalar_prefetch = 1 : i64, scratch_operands = 0 : i64, tpu.core_type = #tpu.core_type<tc>, window_params = [{transform_indices = @transform_0, window_bounds = array<i64: 32, 1024>}, {transform_indices = @transform_1, window_bounds = array<i64: 32, 1024>}, {transform_indices = @transform_2, window_bounds = array<i64: 32, 1>}]} {
    %0 = tpu.iota {dimensions = array<i32: 0>} : vector<32x1024xi32>
    %c32_i32 = arith.constant 32 : i32
    %1 = arith.muli %arg0, %c32_i32 : i32
    %2 = vector.broadcast %1 : i32 to vector<32x1024xi32>
    %3 = arith.addi %0, %2 : vector<32x1024xi32>
    %4 = tpu.iota {dimensions = array<i32: 1>} : vector<32x1024xi32>
    %c1024_i32 = arith.constant 1024 : i32
    %5 = arith.muli %arg1, %c1024_i32 : i32
    %6 = vector.broadcast %5 : i32 to vector<32x1024xi32>
    %7 = arith.addi %4, %6 : vector<32x1024xi32>
    %c1024_i32_0 = arith.constant 1024 : i32
    %8 = vector.broadcast %c1024_i32_0 : i32 to vector<32x1024xi32>
    %9 = arith.muli %3, %8 : vector<32x1024xi32>
    %10 = arith.addi %9, %7 : vector<32x1024xi32>
    %c0 = arith.constant 0 : index
    %11 = memref.load %arg2[%c0] : memref<1xi32, #tpu.memory_space<smem>>
    %12 = vector.broadcast %11 : i32 to vector<32x1024xi32>
    %13 = arith.addi %10, %12 : vector<32x1024xi32>
    %c16_i32 = arith.constant 16 : i32
    %14 = vector.broadcast %c16_i32 : i32 to vector<32x1024xi32>
    %15 = arith.shrui %13, %14 : vector<32x1024xi32>
    %16 = arith.xori %13, %15 : vector<32x1024xi32>
    %c2146121005_i32 = arith.constant 2146121005 : i32
    %17 = vector.broadcast %c2146121005_i32 : i32 to vector<32x1024xi32>
    %18 = arith.muli %16, %17 : vector<32x1024xi32>
    %c15_i32 = arith.constant 15 : i32
    %19 = vector.broadcast %c15_i32 : i32 to vector<32x1024xi32>
    %20 = arith.shrui %18, %19 : vector<32x1024xi32>
    %21 = arith.xori %18, %20 : vector<32x1024xi32>
    %c-2073254261_i32 = arith.constant -2073254261 : i32
    %22 = vector.broadcast %c-2073254261_i32 : i32 to vector<32x1024xi32>
    %23 = arith.muli %21, %22 : vector<32x1024xi32>
    %c16_i32_1 = arith.constant 16 : i32
    %24 = vector.broadcast %c16_i32_1 : i32 to vector<32x1024xi32>
    %25 = arith.shrui %23, %24 : vector<32x1024xi32>
    %26 = arith.xori %23, %25 : vector<32x1024xi32>
    %c8_i32 = arith.constant 8 : i32
    %27 = vector.broadcast %c8_i32 : i32 to vector<32x1024xi32>
    %28 = arith.shrui %26, %27 : vector<32x1024xi32>
    %29 = arith.sitofp %28 : vector<32x1024xi32> to vector<32x1024xf32>
    %cst = arith.constant 5.96046448E-8 : f32
    %30 = vector.broadcast %cst : f32 to vector<32x1024xf32>
    %31 = arith.mulf %29, %30 : vector<32x1024xf32>
    %c0_2 = arith.constant 0 : index
    %c0_3 = arith.constant 0 : index
    %32 = vector.load %arg3[%c0_2, %c0_3] : memref<32x1024xi8, #tpu.memory_space<vmem>>, vector<32x1024xi8>
    %33 = arith.extui %32 : vector<32x1024xi8> to vector<32x1024xi32>
    %34 = arith.sitofp %33 : vector<32x1024xi32> to vector<32x1024xf32>
    %35 = arith.addf %34, %31 : vector<32x1024xf32>
    %cst_4 = arith.constant 3.906250e-03 : f32
    %36 = vector.broadcast %cst_4 : f32 to vector<32x1024xf32>
    %37 = arith.mulf %35, %36 : vector<32x1024xf32>
    %cst_5 = arith.constant 0.999989986 : f32
    %38 = vector.broadcast %cst_5 : f32 to vector<32x1024xf32>
    %39 = arith.mulf %37, %38 : vector<32x1024xf32>
    %cst_6 = arith.constant 5.000000e-06 : f32
    %40 = vector.broadcast %cst_6 : f32 to vector<32x1024xf32>
    %41 = arith.addf %39, %40 : vector<32x1024xf32>
    %42 = math.log %41 : vector<32x1024xf32>
    %cst_7 = arith.constant 1.000000e+00 : f32
    %43 = vector.broadcast %cst_7 : f32 to vector<32x1024xf32>
    %44 = arith.subf %43, %41 : vector<32x1024xf32>
    %45 = math.log %44 : vector<32x1024xf32>
    %46 = arith.subf %42, %45 : vector<32x1024xf32>
    %c0_8 = arith.constant 0 : index
    %c0_9 = arith.constant 0 : index
    %47 = vector.load %arg4[%c0_8, %c0_9] : memref<32x1024xf32, #tpu.memory_space<vmem>>, vector<32x1024xf32>
    tpu.vector_store %arg4[%c0_8, %c0_9], %46 {strides = array<i32>} : memref<32x1024xf32, #tpu.memory_space<vmem>>, vector<32x1024xf32>,
    %cst_10 = arith.constant 0.000000e+00 : f32
    %48 = vector.broadcast %cst_10 : f32 to vector<32x1024xf32>
    %49 = arith.subf %48, %42 : vector<32x1024xf32>
    %50 = arith.subf %49, %45 : vector<32x1024xf32>
    %cst_11 = arith.constant dense<0.000000e+00> : vector<32xf32>
    %51 = vector.multi_reduction <add>, %50, %cst_11 [1] : vector<32x1024xf32> to vector<32xf32>
    %52 = vector.shape_cast %51 : vector<32xf32> to vector<32x1xf32>
    %c0_i32 = arith.constant 0 : i32
    %53 = arith.cmpi eq, %arg1, %c0_i32 : i32
    %54 = arith.extui %53 : i1 to i32
    %c0_i32_12 = arith.constant 0 : i32
    %55 = arith.cmpi ne, %54, %c0_i32_12 : i32
    scf.if %55 {
      %cst_17 = arith.constant 0.000000e+00 : f32
      %59 = vector.broadcast %cst_17 : f32 to vector<32x1xf32>
      %c0_18 = arith.constant 0 : index
      %c0_19 = arith.constant 0 : index
      %60 = vector.load %arg5[%c0_18, %c0_19] : memref<32x1xf32, #tpu.memory_space<vmem>>, vector<32x1xf32>
      tpu.vector_store %arg5[%c0_18, %c0_19], %59 {strides = array<i32>} : memref<32x1xf32, #tpu.memory_space<vmem>>, vector<32x1xf32>,
    } else {
    }
    %c0_13 = arith.constant 0 : index
    %c0_14 = arith.constant 0 : index
    %56 = vector.load %arg5[%c0_13, %c0_14] : memref<32x1xf32, #tpu.memory_space<vmem>>, vector<32x1xf32>
    %57 = arith.addf %56, %52 : vector<32x1xf32>
    %c0_15 = arith.constant 0 : index
    %c0_16 = arith.constant 0 : index
    %58 = vector.load %arg5[%c0_15, %c0_16] : memref<32x1xf32, #tpu.memory_space<vmem>>, vector<32x1xf32>
    tpu.vector_store %arg5[%c0_15, %c0_16], %57 {strides = array<i32>} : memref<32x1xf32, #tpu.memory_space<vmem>>, vector<32x1xf32>,
    return
  }
  func.func @transform_0(%arg0: i32, %arg1: i32, %arg2: memref<1xi32, #tpu.memory_space<smem>>) -> (i32, i32) {
    %c0_i32 = arith.constant 0 : i32
    return %arg0, %arg1 : i32, i32
  }
  func.func @transform_1(%arg0: i32, %arg1: i32, %arg2: memref<1xi32, #tpu.memory_space<smem>>) -> (i32, i32) {
    %c0_i32 = arith.constant 0 : i32
    return %arg0, %arg1 : i32, i32
  }
  func.func @transform_2(%arg0: i32, %arg1: i32, %arg2: memref<1xi32, #tpu.memory_space<smem>>) -> (i32, i32) {
    %c0_i32 = arith.constant 0 : i32
    %c0_i32_0 = arith.constant 0 : i32
    return %arg0, %c0_i32 : i32, i32
  }
}

</mosaic_0001>

<bundles_post_ra>
// kernel: tpu_custom_call.1
= control target key start
LH: loop header
LB: loop body
LE: loop exit
PB: predicated region body
PF: predicated region fallthrough
CT: control target
= control target key end

     0   :  { %10 = vsyncpa [#allocation5], 0  ;;  %s1897_s0 = inlined_call_operand.<no memory space> [shape: s32[1], index: 0, kind: input, shape index: {}]   ;;  %s1898_s1 = inlined_call_operand.hbm [shape: u8[32,1024], index: 1, kind: input, shape index: {}]   ;;  %s1899_s2 = inlined_call_operand.hbm [shape: f32[32,1024], index: 2, kind: output, shape index: {0}]   ;;  %s1900_s3 = inlined_call_operand.vmem [shape: f32[32,1], index: 3, kind: output, shape index: {1}]  }
   0x1   :  { %11 = vsyncpa [#allocation6], 0  ;;  %s1265_s12 = smov [#allocation4]   ;;  %s1217_s16 = scalar_lea.hbm %s1898_s1, 1024 }
   0x2   :  { %s18_s13 = sshll.u32 %s1265_s12, 4  ;;  %p1218_p0 = scmp.ne.s32.totalorder %s1898_s1, %s1217_s16  ;;  %s19_s13 = int_to_ptr.vmem [resolvable:$true] %s18_s13 }
   0x3   :  { %p1221_p1 = scmp.lt.u32.totalorder %s1217_s16, %s1898_s1 }
   0x5   :  { %p1223_p2 = pnand %p1221_p1, %p1218_p0 }
   0x7   :  { %1226 = shalt.err (!%p1223_p2)
}
   0x8   :  { %s1227_s21 = scalar_lea.vmem %s19_s13, 1024  ;;  %p1232_p4 = scmp.lt.s32.totalorder %s19_s13, %s19_s13 }
   0x9   :  { %p1228_p3 = scmp.ne.s32.totalorder %s19_s13, %s1227_s21  ;;  %p1233_p5 = scmp.lt.s32.totalorder %s1227_s21, %s1227_s21 }
   0xb   :  { %p1234_p6 = por %p1233_p5, %p1232_p4 }
   0xd   :  { %p1235_p7 = pnand %p1234_p6, %p1228_p3 }
   0xf   :  { %1238 = shalt.err (!%p1235_p7)
}
  0x10   :  { %21 = dma.hbm_to_vmem [thread:$0]  %s1898_s1, 1024, %s19_s13, [#allocation5]  }
  0x11   :  { %1261 = dma.done.wait [#allocation5], 1024  }
  0x12   :  { %1262 = vsyncadd [#allocation5], 4294966272  ;;  %v25_v0 = vlaneseq  ;;  %v1328_v12 = vstv %s1897_s0  ;;  %v1352_v40 = vld [vmem:[#allocation4] sm:$0xff]  ;;  %v1354_v41 = vld [vmem:[#allocation4 + $0x8] sm:$0xff]  ;;  %vm1037_vm0 = vcmask 7168   ;;  %s1267_s9 = smov [#allocation7]  }
  0x13   :  { %v1356_v46 = vld [vmem:[#allocation4 + $0x10] sm:$0xff]  ;;  %v1358_v47 = vld [vmem:[#allocation4 + $0x18] sm:$0xff]  ;;  %v501_v54 = vunpack.c.2.s8 %v1352_v40  ;;  %v502_v55 = vunpack.c.2.s8 %v1354_v41  ;;  %s1060_s10 = sshll.u32 %s1267_s9, 4  ;;  %s1849_s10 = int_to_ptr.vmem [resolvable:$true] %s1060_s10 }
  0x14   :  { %v26_v1 = vshrl.u32 %v25_v0, 7  ;;  %v1302_v2 = vand.u32 127, %v25_v0  ;;  %v503_v58 = vunpack.c.2.s8 %v1356_v46  ;;  %v504_v59 = vunpack.c.2.s8 %v1358_v47  ;;  %s1239_s11 = scalar_lea.vmem %s1849_s10, 4096  ;;  %p1244_p9 = scmp.lt.s32.totalorder %s1849_s10, %s1849_s10 }
  0x15   :  { %p1240_p8 = scmp.ne.s32.totalorder %s1849_s10, %s1239_s11  ;;  %p1245_p10 = scmp.lt.s32.totalorder %s1239_s11, %s1239_s11 }
  0x16   :  { %v28_v3 = vadd.s32 16, %v26_v1  ;;  %v1305_v4 = vadd.s32 128, %v1302_v2  ;;  %v1308_v5 = vadd.s32 256, %v1302_v2  ;;  %v1311_v6 = vadd.s32 384, %v1302_v2 }
  0x17   :  { %v1314_v7 = vadd.s32 512, %v1302_v2  ;;  %v1317_v8 = vadd.s32 640, %v1302_v2  ;;  %v1320_v9 = vadd.s32 768, %v1302_v2  ;;  %v1323_v10 = vadd.s32 896, %v1302_v2  ;;  %p1246_p11 = por %p1245_p10, %p1244_p9 }
  0x18   :  { %v57_v11 = vmul.u32 1024, %v28_v3  ;;  %v1330_v13 = vmul.u32 1024, %v26_v1  ;;  %v1332_v14 = vadd.s32 24, %v26_v1  ;;  %v1334_v15 = vadd.s32 8, %v26_v1 }
  0x19   :  { %p1247_p12 = pnand %p1246_p11, %p1240_p8 }
  0x1a   :  { %v75_v16 = vadd.s32 %v57_v11, %v1302_v2  ;;  %v76_v17 = vadd.s32 %v57_v11, %v1305_v4  ;;  %v77_v18 = vadd.s32 %v57_v11, %v1308_v5  ;;  %v78_v19 = vadd.s32 %v57_v11, %v1311_v6 }
  0x1b   :  { %v79_v20 = vadd.s32 %v57_v11, %v1314_v7  ;;  %v80_v21 = vadd.s32 %v57_v11, %v1317_v8  ;;  %v81_v22 = vadd.s32 %v57_v11, %v1320_v9  ;;  %v82_v23 = vadd.s32 %v57_v11, %v1323_v10 }
  0x1c   :  { %v109_v24 = vadd.s32 %v1328_v12, %v75_v16  ;;  %v110_v25 = vadd.s32 %v1328_v12, %v76_v17  ;;  %v111_v26 = vadd.s32 %v1328_v12, %v77_v18  ;;  %v112_v27 = vadd.s32 %v1328_v12, %v78_v19 }
  0x1d   :  { %v113_v28 = vadd.s32 %v1328_v12, %v79_v20  ;;  %v114_v29 = vadd.s32 %v1328_v12, %v80_v21  ;;  %v115_v30 = vadd.s32 %v1328_v12, %v81_v22  ;;  %v116_v31 = vadd.s32 %v1328_v12, %v82_v23 }
  0x1e   :  { %v141_v32 = vshrl.u32 %v109_v24, 16  ;;  %v142_v33 = vshrl.u32 %v110_v25, 16  ;;  %v143_v34 = vshrl.u32 %v111_v26, 16  ;;  %v144_v35 = vshrl.u32 %v112_v27, 16 }
  0x1f   :  { %v145_v36 = vshrl.u32 %v113_v28, 16  ;;  %v146_v37 = vshrl.u32 %v114_v29, 16  ;;  %v147_v38 = vshrl.u32 %v115_v30, 16  ;;  %v148_v39 = vshrl.u32 %v116_v31, 16 }
  0x20   :  { %v173_v42 = vxor.u32 %v141_v32, %v109_v24  ;;  %v174_v43 = vxor.u32 %v142_v33, %v110_v25  ;;  %v175_v44 = vxor.u32 %v143_v34, %v111_v26  ;;  %v176_v45 = vxor.u32 %v144_v35, %v112_v27 }
  0x21   :  { %v177_v48 = vxor.u32 %v145_v36, %v113_v28  ;;  %v178_v49 = vxor.u32 %v146_v37, %v114_v29  ;;  %v179_v50 = vxor.u32 %v147_v38, %v115_v30  ;;  %v180_v51 = vxor.u32 %v148_v39, %v116_v31 }
  0x22   :  { %v205_v52 = vmul.u32 2146121005, %v173_v42  ;;  %v206_v53 = vmul.u32 2146121005, %v174_v43 }
  0x23   :  { %v207_v56 = vmul.u32 2146121005, %v175_v44  ;;  %v208_v57 = vmul.u32 2146121005, %v176_v45 }
  0x24   :  { %v209_v60 = vmul.u32 2146121005, %v177_v48  ;;  %v210_v61 = vmul.u32 2146121005, %v178_v49  ;;  %v237_v62 = vshrl.u32 %v205_v52, 15  ;;  %v238_v63 = vshrl.u32 %v206_v53, 15 }
  0x25   :  { %v211_v0 = vmul.u32 2146121005, %v179_v50  ;;  %v212_v1 = vmul.u32 2146121005, %v180_v51  ;;  %v239_v3 = vshrl.u32 %v207_v56, 15  ;;  %v240_v11 = vshrl.u32 %v208_v57, 15 }
  0x26   :  { %v241_v16 = vshrl.u32 %v209_v60, 15  ;;  %v242_v17 = vshrl.u32 %v210_v61, 15  ;;  %v269_v18 = vxor.u32 %v237_v62, %v205_v52  ;;  %v270_v19 = vxor.u32 %v238_v63, %v206_v53 }
  0x27   :  { %v243_v20 = vshrl.u32 %v211_v0, 15  ;;  %v244_v21 = vshrl.u32 %v212_v1, 15  ;;  %v271_v22 = vxor.u32 %v239_v3, %v207_v56  ;;  %v272_v23 = vxor.u32 %v240_v11, %v208_v57 }
  0x28   :  { %v273_v24 = vxor.u32 %v241_v16, %v209_v60  ;;  %v274_v25 = vxor.u32 %v242_v17, %v210_v61  ;;  %v301_v26 = vmul.u32 2221713035, %v269_v18  ;;  %v302_v27 = vmul.u32 2221713035, %v270_v19 }
  0x29   :  { %v275_v28 = vxor.u32 %v243_v20, %v211_v0  ;;  %v276_v29 = vxor.u32 %v244_v21, %v212_v1  ;;  %v303_v30 = vmul.u32 2221713035, %v271_v22  ;;  %v304_v31 = vmul.u32 2221713035, %v272_v23  ;;  %v1364_v20 = vld [vmem:[#allocation4 + $0x20] sm:$0xff]  ;;  %v1366_v21 = vld [vmem:[#allocation4 + $0x28] sm:$0xff] }
  0x2a   :  { %v305_v32 = vmul.u32 2221713035, %v273_v24  ;;  %v306_v33 = vmul.u32 2221713035, %v274_v25  ;;  %v333_v34 = vshrl.u32 %v301_v26, 16  ;;  %v334_v35 = vshrl.u32 %v302_v27, 16 }
  0x2b   :  { %v307_v36 = vmul.u32 2221713035, %v275_v28  ;;  %v308_v37 = vmul.u32 2221713035, %v276_v29  ;;  %v335_v38 = vshrl.u32 %v303_v30, 16  ;;  %v336_v39 = vshrl.u32 %v304_v31, 16 }
  0x2c   :  { %v337_v42 = vshrl.u32 %v305_v32, 16  ;;  %v338_v43 = vshrl.u32 %v306_v33, 16  ;;  %v365_v44 = vxor.u32 %v333_v34, %v301_v26  ;;  %v366_v45 = vxor.u32 %v334_v35, %v302_v27  ;;  %v1368_v26 = vld [vmem:[#allocation4 + $0x30] sm:$0xff]  ;;  %v1370_v27 = vld [vmem:[#allocation4 + $0x38] sm:$0xff] }
  0x2d   :  { %v339_v48 = vshrl.u32 %v307_v36, 16  ;;  %v340_v49 = vshrl.u32 %v308_v37, 16  ;;  %v367_v50 = vxor.u32 %v335_v38, %v303_v30  ;;  %v368_v51 = vxor.u32 %v336_v39, %v304_v31 }
  0x2e   :  { %v369_v52 = vxor.u32 %v337_v42, %v305_v32  ;;  %v370_v53 = vxor.u32 %v338_v43, %v306_v33  ;;  %v397_v56 = vshrl.u32 %v365_v44, 8  ;;  %v398_v57 = vshrl.u32 %v366_v45, 8 }
  0x2f   :  { %v371_v60 = vxor.u32 %v339_v48, %v307_v36  ;;  %v372_v61 = vxor.u32 %v340_v49, %v308_v37  ;;  %v399_v62 = vshrl.u32 %v367_v50, 8  ;;  %v400_v63 = vshrl.u32 %v368_v51, 8 }
  0x30   :  { %v401_v0 = vshrl.u32 %v369_v52, 8  ;;  %v402_v1 = vshrl.u32 %v370_v53, 8  ;;  %v429_v3 = vcvt.s32.f32 %v397_v56  ;;  %v430_v11 = vcvt.s32.f32 %v398_v57 }
  0x31   :  { %v403_v16 = vshrl.u32 %v371_v60, 8  ;;  %v404_v17 = vshrl.u32 %v372_v61, 8  ;;  %v431_v18 = vcvt.s32.f32 %v399_v62  ;;  %v432_v19 = vcvt.s32.f32 %v400_v63 }
  0x32   :  { %v433_v22 = vcvt.s32.f32 %v401_v0  ;;  %v434_v23 = vcvt.s32.f32 %v402_v1  ;;  %v461_v24 = vmul.f32 5.9604645e-08, %v429_v3  ;;  %v462_v25 = vmul.f32 5.9604645e-08, %v430_v11 }
  0x33   :  { %v435_v28 = vcvt.s32.f32 %v403_v16  ;;  %v436_v29 = vcvt.s32.f32 %v404_v17  ;;  %v463_v30 = vmul.f32 5.9604645e-08, %v431_v18  ;;  %v464_v31 = vmul.f32 5.9604645e-08, %v432_v19 }
  0x34   :  { %v465_v32 = vmul.f32 5.9604645e-08, %v433_v22  ;;  %v466_v33 = vmul.f32 5.9604645e-08, %v434_v23  ;;  %v505_v34 = vunpack.c.2.s8 %v1364_v20  ;;  %v506_v35 = vunpack.c.2.s8 %v1366_v21 }
  0x35   :  { %v467_v36 = vmul.f32 5.9604645e-08, %v435_v28  ;;  %v468_v37 = vmul.f32 5.9604645e-08, %v436_v29  ;;  %v507_v38 = vunpack.c.2.s8 %v1368_v26  ;;  %v508_v39 = vunpack.c.2.s8 %v1370_v27 }
  0x36   :  { %v533_v42 = vand.u32 255, %v501_v54  ;;  %v534_v43 = vand.u32 255, %v502_v55  ;;  %v535_v44 = vand.u32 255, %v503_v58  ;;  %v536_v45 = vand.u32 255, %v504_v59 }
  0x37   :  { %v537_v48 = vand.u32 255, %v505_v34  ;;  %v538_v49 = vand.u32 255, %v506_v35  ;;  %v539_v50 = vand.u32 255, %v507_v38  ;;  %v540_v51 = vand.u32 255, %v508_v39 }
  0x38   :  { %v565_v52 = vcvt.s32.f32 %v533_v42  ;;  %v566_v53 = vcvt.s32.f32 %v534_v43  ;;  %v567_v56 = vcvt.s32.f32 %v535_v44  ;;  %v568_v57 = vcvt.s32.f32 %v536_v45 }
  0x39   :  { %v569_v60 = vcvt.s32.f32 %v537_v48  ;;  %v570_v61 = vcvt.s32.f32 %v538_v49  ;;  %v571_v54 = vcvt.s32.f32 %v539_v50  ;;  %v572_v62 = vcvt.s32.f32 %v540_v51 }
  0x3a   :  { %v597_v63 = vadd.f32 %v565_v52, %v461_v24  ;;  %v598_v55 = vadd.f32 %v566_v53, %v462_v25  ;;  %v599_v0 = vadd.f32 %v567_v56, %v463_v30  ;;  %v600_v1 = vadd.f32 %v568_v57, %v464_v31 }
  0x3b   :  { %v601_v58 = vadd.f32 %v569_v60, %v465_v32  ;;  %v602_v3 = vadd.f32 %v570_v61, %v466_v33  ;;  %v603_v11 = vadd.f32 %v571_v54, %v467_v36  ;;  %v604_v59 = vadd.f32 %v572_v62, %v468_v37 }
  0x3c   :  { %v629_v16 = vmul.f32 0.00390625, %v597_v63  ;;  %v630_v17 = vmul.f32 0.00390625, %v598_v55  ;;  %v631_v18 = vmul.f32 0.00390625, %v599_v0  ;;  %v632_v19 = vmul.f32 0.00390625, %v600_v1 }
  0x3d   :  { %v633_v22 = vmul.f32 0.00390625, %v601_v58  ;;  %v634_v23 = vmul.f32 0.00390625, %v602_v3  ;;  %v635_v28 = vmul.f32 0.00390625, %v603_v11  ;;  %v636_v29 = vmul.f32 0.00390625, %v604_v59 }
  0x3e   :  { %v661_v34 = vmul.f32 0.99999, %v629_v16  ;;  %v662_v35 = vmul.f32 0.99999, %v630_v17  ;;  %v663_v38 = vmul.f32 0.99999, %v631_v18  ;;  %v59_v24 = vadd.s32 %v1330_v13, %v1302_v2 }
  0x3f   :  { %v664_v25 = vmul.f32 0.99999, %v632_v19  ;;  %v665_v30 = vmul.f32 0.99999, %v633_v22  ;;  %v666_v31 = vmul.f32 0.99999, %v634_v23  ;;  %v60_v32 = vadd.s32 %v1330_v13, %v1305_v4 }
  0x40   :  { %v667_v33 = vmul.f32 0.99999, %v635_v28  ;;  %v668_v36 = vmul.f32 0.99999, %v636_v29  ;;  %v693_v37 = vadd.f32 5e-06, %v661_v34  ;;  %v61_v39 = vadd.s32 %v1330_v13, %v1308_v5 }
  0x41   :  { %v694_v42 = vadd.f32 5e-06, %v662_v35  ;;  %v695_v43 = vadd.f32 5e-06, %v663_v38  ;;  %v696_v44 = vadd.f32 5e-06, %v664_v25  ;;  %v62_v45 = vadd.s32 %v1330_v13, %v1311_v6 }
  0x42   :  { %v697_v48 = vadd.f32 5e-06, %v665_v30  ;;  %v698_v49 = vadd.f32 5e-06, %v666_v31  ;;  %v699_v50 = vadd.f32 5e-06, %v667_v33  ;;  %1081 = vlog2.f32 %v693_v37 }
  0x43   :  { %v1392_v51 = vadd.f32 5e-06, %v668_v36  ;;  %1083 = vlog2.f32 %v694_v42  ;;  %v789_v52 = vsub.f32 1.0, %v693_v37  ;;  %v790_v53 = vsub.f32 1.0, %v694_v42 }
  0x44   :  { %1085 = vlog2.f32 %v695_v43  ;;  %v791_v56 = vsub.f32 1.0, %v695_v43  ;;  %v792_v57 = vsub.f32 1.0, %v696_v44  ;;  %v793_v60 = vsub.f32 1.0, %v697_v48 }
  0x45   :  { %1087 = vlog2.f32 %v696_v44  ;;  %v794_v61 = vsub.f32 1.0, %v698_v49  ;;  %v795_v54 = vsub.f32 1.0, %v699_v50  ;;  %v796_v62 = vsub.f32 1.0, %v1392_v51 }
  0x46   :  { %1089 = vlog2.f32 %v697_v48  ;;  %v63_v63 = vadd.s32 %v1330_v13, %v1314_v7  ;;  %v64_v55 = vadd.s32 %v1330_v13, %v1317_v8  ;;  %v65_v0 = vadd.s32 %v1330_v13, %v1320_v9 }
  0x47   :  { %1091 = vlog2.f32 %v698_v49  ;;  %v66_v1 = vadd.s32 %v1330_v13, %v1323_v10  ;;  %v93_v58 = vadd.s32 %v1328_v12, %v59_v24  ;;  %v94_v3 = vadd.s32 %v1328_v12, %v60_v32 }
  0x48   :  { %1093 = vlog2.f32 %v699_v50  ;;  %v95_v11 = vadd.s32 %v1328_v12, %v61_v39  ;;  %v96_v59 = vadd.s32 %v1328_v12, %v62_v45  ;;  %v97_v16 = vadd.s32 %v1328_v12, %v63_v63 }
  0x49   :  { %1095 = vlog2.f32 %v1392_v51  ;;  %v98_v17 = vadd.s32 %v1328_v12, %v64_v55  ;;  %v99_v18 = vadd.s32 %v1328_v12, %v65_v0  ;;  %v100_v19 = vadd.s32 %v1328_v12, %v66_v1 }
  0x4a   :  { %1097 = vlog2.f32 %v789_v52  ;;  %v125_v13 = vshrl.u32 %v93_v58, 16  ;;  %v126_v22 = vshrl.u32 %v94_v3, 16  ;;  %v127_v23 = vshrl.u32 %v95_v11, 16 }
  0x4b   :  { %1099 = vlog2.f32 %v790_v53  ;;  %v128_v28 = vshrl.u32 %v96_v59, 16  ;;  %v129_v29 = vshrl.u32 %v97_v16, 16  ;;  %v130_v34 = vshrl.u32 %v98_v17, 16 }
  0x4c   :  { %v1082_v35 = vpop.eup %1081  ;;  %1101 = vlog2.f32 %v791_v56  ;;  %v131_v38 = vshrl.u32 %v99_v18, 16  ;;  %v132_v24 = vshrl.u32 %v100_v19, 16  ;;  %v1412_v25 = vxor.u32 %v125_v13, %v93_v58 }
  0x4d   :  { %v1084_v30 = vpop.eup %1083  ;;  %v1414_v31 = vmul.f32 0.6931472, %v1082_v35  ;;  %1103 = vlog2.f32 %v792_v57  ;;  %v1416_v32 = vxor.u32 %v126_v22, %v94_v3  ;;  %v1418_v33 = vxor.u32 %v127_v23, %v95_v11 }
  0x4e   :  { %v1086_v36 = vpop.eup %1085  ;;  %v1420_v37 = vmul.f32 0.6931472, %v1084_v30  ;;  %1105 = vlog2.f32 %v793_v60  ;;  %v1422_v39 = vxor.u32 %v128_v28, %v96_v59  ;;  %v1424_v42 = vxor.u32 %v129_v29, %v97_v16 }
  0x4f   :  { %1931 = vst [vmem:[#allocation10_spill] sm:$0xff] %v1414_v31  ;;  %v1088_v43 = vpop.eup %1087  ;;  %v1426_v44 = vmul.f32 0.6931472, %v1086_v36  ;;  %1107 = vlog2.f32 %v794_v61  ;;  %v949_v45 = vsub.f32 0.0, %v1414_v31  ;;  %v1429_v48 = vxor.u32 %v130_v34, %v98_v17 }
  0x50   :  { %1932 = vst [vmem:[#allocation11_spill] sm:$0xff] %v1420_v37  ;;  %v1090_v49 = vpop.eup %1089  ;;  %v1431_v50 = vmul.f32 0.6931472, %v1088_v43  ;;  %1109 = vlog2.f32 %v795_v54  ;;  %v950_v51 = vsub.f32 0.0, %v1420_v37  ;;  %v1434_v52 = vxor.u32 %v131_v38, %v99_v18 }
  0x51   :  { %1933 = vst [vmem:[#allocation12_spill] sm:$0xff] %v1426_v44  ;;  %v1092_v53 = vpop.eup %1091  ;;  %v1436_v56 = vmul.f32 0.6931472, %v1090_v49  ;;  %1111 = vlog2.f32 %v796_v62  ;;  %v951_v57 = vsub.f32 0.0, %v1426_v44  ;;  %v1439_v60 = vxor.u32 %v132_v24, %v100_v19 }
  0x52   :  { %1934 = vst [vmem:[#allocation13_spill] sm:$0xff] %v1431_v50  ;;  %v1094_v61 = vpop.eup %1093  ;;  %v1441_v63 = vmul.f32 0.6931472, %v1092_v53  ;;  %v952_v55 = vsub.f32 0.0, %v1431_v50  ;;  %v189_v0 = vmul.u32 2146121005, %v1412_v25 }
  0x53   :  { %1935 = vst [vmem:[#allocation14_spill] sm:$0xff] %v1436_v56  ;;  %v1096_v1 = vpop.eup %1095  ;;  %v1446_v58 = vmul.f32 0.6931472, %v1094_v61  ;;  %v953_v3 = vsub.f32 0.0, %v1436_v56  ;;  %v190_v62 = vmul.u32 2146121005, %v1416_v32 }
  0x54   :  { %1936 = vst [vmem:[#allocation15_spill] sm:$0xff] %v1441_v63  ;;  %v1098_v59 = vpop.eup %1097  ;;  %v1451_v16 = vmul.f32 0.6931472, %v1096_v1  ;;  %v954_v17 = vsub.f32 0.0, %v1441_v63  ;;  %v191_v18 = vmul.u32 2146121005, %v1418_v33 }
  0x55   :  { %1937 = vst [vmem:[#allocation16_spill] sm:$0xff] %v1446_v58  ;;  %v221_v19 = vshrl.u32 %v189_v0, 15  ;;  %v1100_v13 = vpop.eup %1099  ;;  %v1455_v22 = vmul.f32 0.6931472, %v1098_v59  ;;  %v955_v23 = vsub.f32 0.0, %v1446_v58  ;;  %v222_v29 = vshrl.u32 %v190_v62, 15 }
  0x56   :  { %1938 = vst [vmem:[#allocation17_spill] sm:$0xff] %v1451_v16  ;;  %v192_v28 = vmul.u32 2146121005, %v1422_v39  ;;  %v1102_v34 = vpop.eup %1101  ;;  %v1459_v35 = vmul.f32 0.6931472, %v1100_v13  ;;  %v956_v38 = vsub.f32 0.0, %v1451_v16 }
  0x57   :  { %1939 = vst [vmem:[#allocation18_spill] sm:$0xff] %v1455_v22  ;;  %v193_v24 = vmul.u32 2146121005, %v1424_v42  ;;  %v223_v25 = vshrl.u32 %v191_v18, 15  ;;  %v1104_v30 = vpop.eup %1103  ;;  %v1463_v32 = vmul.f32 0.6931472, %v1102_v34  ;;  %v981_v33 = vsub.f32 %v949_v45, %v1455_v22 }
  0x58   :  { %1940 = vst [vmem:[#allocation19_spill] sm:$0xff] %v1459_v35  ;;  %v194_v36 = vmul.u32 2146121005, %v1429_v48  ;;  %v195_v43 = vmul.u32 2146121005, %v1434_v52  ;;  %v1106_v49 = vpop.eup %1105  ;;  %v982_v53 = vsub.f32 %v950_v51, %v1459_v35  ;;  %v224_v1 = vshrl.u32 %v192_v28, 15 }
  0x59   :  { %1941 = vst [vmem:[#allocation20_spill] sm:$0xff] %v1463_v32  ;;  %v1468_v39 = vmul.f32 0.6931472, %v1104_v30  ;;  %v196_v61 = vmul.u32 2146121005, %v1439_v60  ;;  %v1108_v59 = vpop.eup %1107  ;;  %v983_v13 = vsub.f32 %v951_v57, %v1463_v32  ;;  %v225_v34 = vshrl.u32 %v193_v24, 15 }
  0x5a   :  { %v1472_v42 = vmul.f32 0.6931472, %v1106_v49  ;;  %v226_v11 = vshrl.u32 %v194_v36, 15  ;;  %v1110_v45 = vpop.eup %1109  ;;  %v1475_v54 = vmul.f32 0.6931472, %v1108_v59  ;;  %v1015_v52 = vadd.f32 %v982_v53, %v981_v33 }
  0x5b   :  { %1942 = vst [vmem:[#allocation21_spill] sm:$0xff] %v1468_v39  ;;  %v984_v48 = vsub.f32 %v952_v55, %v1468_v39  ;;  %v227_v30 = vshrl.u32 %v195_v43, 15  ;;  %v1112_v16 = vpop.eup %1111  ;;  %v1478_v58 = vmul.f32 0.6931472, %v1110_v45  ;;  %v228_v60 = vshrl.u32 %v196_v61, 15 }
  0x5c   :  { %1943 = vst [vmem:[#allocation22_spill] sm:$0xff] %v1472_v42  ;;  %1944 = vst [vmem:[#allocation23_spill] sm:$0xff] %v1475_v54  ;;  %v985_v51 = vsub.f32 %v953_v3, %v1472_v42  ;;  %v253_v63 = vxor.u32 %v221_v19, %v189_v0  ;;  %v1481_v49 = vmul.f32 0.6931472, %v1112_v16  ;;  %v986_v57 = vsub.f32 %v954_v17, %v1475_v54 }
  0x5d   :  { %1945 = vst [vmem:[#allocation24_spill] sm:$0xff] %v1478_v58  ;;  %v1016_v56 = vadd.f32 %v1015_v52, %v983_v13  ;;  %v254_v50 = vxor.u32 %v222_v29, %v190_v62  ;;  %v987_v59 = vsub.f32 %v955_v23, %v1478_v58  ;;  %v255_v44 = vxor.u32 %v223_v25, %v191_v18 }
  0x5e   :  { %1946 = vst [vmem:[#allocation25_spill] sm:$0xff] %v1481_v49  ;;  %v256_v32 = vxor.u32 %v224_v1, %v192_v28  ;;  %v257_v55 = vxor.u32 %v225_v34, %v193_v24  ;;  %v988_v33 = vsub.f32 %v956_v38, %v1481_v49  ;;  %v258_v45 = vxor.u32 %v226_v11, %v194_v36 }
  0x5f   :  { %v1017_v53 = vadd.f32 %v1016_v56, %v984_v48  ;;  %v259_v39 = vxor.u32 %v227_v30, %v195_v43  ;;  %v260_v37 = vxor.u32 %v228_v60, %v196_v61  ;;  %v285_v3 = vmul.u32 2221713035, %v253_v63 }
  0x60   :  { %v286_v42 = vmul.u32 2221713035, %v254_v50  ;;  %v487_v0 = vunpack.c.0.s8 %v1356_v46  ;;  %v287_v19 = vmul.u32 2221713035, %v255_v44  ;;  %v488_v62 = vunpack.c.0.s8 %v1358_v47 }
  0x61   :  { %v1018_v16 = vadd.f32 %v1017_v53, %v985_v51  ;;  %v288_v17 = vmul.u32 2221713035, %v256_v32  ;;  %v289_v29 = vmul.u32 2221713035, %v257_v55  ;;  %v317_v18 = vshrl.u32 %v285_v3, 16 }
  0x62   :  { %v290_v23 = vmul.u32 2221713035, %v258_v45  ;;  %v318_v28 = vshrl.u32 %v286_v42, 16  ;;  %v291_v25 = vmul.u32 2221713035, %v259_v39  ;;  %v319_v56 = vshrl.u32 %v287_v19, 16 }
  0x63   :  { %v1019_v24 = vadd.f32 %v1018_v16, %v986_v57  ;;  %v292_v38 = vmul.u32 2221713035, %v260_v37  ;;  %v320_v11 = vshrl.u32 %v288_v17, 16  ;;  %v321_v36 = vshrl.u32 %v289_v29, 16 }
  0x64   :  { %v322_v43 = vshrl.u32 %v290_v23, 16  ;;  %v349_v63 = vxor.u32 %v317_v18, %v285_v3  ;;  %v323_v61 = vshrl.u32 %v291_v25, 16  ;;  %v350_v13 = vxor.u32 %v318_v28, %v286_v42 }
  0x65   :  { %v1020_v50 = vadd.f32 %v1019_v24, %v987_v59  ;;  %v324_v1 = vshrl.u32 %v292_v38, 16  ;;  %v351_v44 = vxor.u32 %v319_v56, %v287_v19  ;;  %v352_v32 = vxor.u32 %v320_v11, %v288_v17 }
  0x66   :  { %v353_v34 = vxor.u32 %v321_v36, %v289_v29  ;;  %v354_v48 = vxor.u32 %v322_v43, %v290_v23  ;;  %v355_v30 = vxor.u32 %v323_v61, %v291_v25  ;;  %v381_v60 = vshrl.u32 %v349_v63, 8 }
  0x67   :  { %v1021_v52 = vadd.f32 %v1020_v50, %v988_v33  ;;  %v356_v51 = vxor.u32 %v324_v1, %v292_v38  ;;  %v382_v57 = vshrl.u32 %v350_v13, 8  ;;  %v383_v39 = vshrl.u32 %v351_v44, 8 }
  0x68   :  { %v384_v37 = vshrl.u32 %v352_v32, 8  ;;  %v385_v55 = vshrl.u32 %v353_v34, 8  ;;  %v386_v53 = vshrl.u32 %v354_v48, 8  ;;  %v387_v45 = vshrl.u32 %v355_v30, 8 }
  0x69   :  { %1022 = vadd.xlane.f32.xlu1 %v1021_v52  ;;  %v388_v3 = vshrl.u32 %v356_v51, 8  ;;  %v413_v59 = vcvt.s32.f32 %v381_v60  ;;  %v414_v16 = vcvt.s32.f32 %v382_v57  ;;  %v415_v18 = vcvt.s32.f32 %v383_v39 }
  0x6a   :  { %v416_v42 = vcvt.s32.f32 %v384_v37  ;;  %v417_v19 = vcvt.s32.f32 %v385_v55  ;;  %v418_v17 = vcvt.s32.f32 %v386_v53  ;;  %v419_v29 = vcvt.s32.f32 %v387_v45 }
  0x6b   :  { %v420_v23 = vcvt.s32.f32 %v388_v3  ;;  %v445_v33 = vmul.f32 5.9604645e-08, %v413_v59  ;;  %v446_v28 = vmul.f32 5.9604645e-08, %v414_v16  ;;  %v447_v24 = vmul.f32 5.9604645e-08, %v415_v18 }
  0x6c   :  { %v448_v25 = vmul.f32 5.9604645e-08, %v416_v42  ;;  %v449_v38 = vmul.f32 5.9604645e-08, %v417_v19  ;;  %v450_v56 = vmul.f32 5.9604645e-08, %v418_v17  ;;  %v451_v11 = vmul.f32 5.9604645e-08, %v419_v29 }
  0x6d   :  { %v452_v36 = vmul.f32 5.9604645e-08, %v420_v23  ;;  %v489_v43 = vunpack.c.0.s8 %v1364_v20  ;;  %v490_v63 = vunpack.c.0.s8 %v1366_v21  ;;  %v491_v50 = vunpack.c.0.s8 %v1368_v26 }
  0x6e   :  { %v492_v61 = vunpack.c.0.s8 %v1370_v27  ;;  %v1947_v1 = vunpack.c.0.s8 %v1352_v40  ;;  %v1948_v44 = vunpack.c.0.s8 %v1354_v41  ;;  %v519_v34 = vand.u32 255, %v487_v0 }
  0x6f   :  { %v520_v48 = vand.u32 255, %v488_v62  ;;  %v521_v52 = vand.u32 255, %v489_v43  ;;  %v522_v30 = vand.u32 255, %v490_v63  ;;  %v523_v51 = vand.u32 255, %v491_v50 }
  0x70   :  { %v517_v13 = vand.u32 255, %v1947_v1  ;;  %v518_v32 = vand.u32 255, %v1948_v44  ;;  %v524_v60 = vand.u32 255, %v492_v61  ;;  %v551_v37 = vcvt.s32.f32 %v519_v34 }
  0x71   :  { %v552_v55 = vcvt.s32.f32 %v520_v48  ;;  %v553_v53 = vcvt.s32.f32 %v521_v52  ;;  %v554_v45 = vcvt.s32.f32 %v522_v30  ;;  %v555_v3 = vcvt.s32.f32 %v523_v51 }
  0x72   :  { %v549_v57 = vcvt.s32.f32 %v517_v13  ;;  %v550_v39 = vcvt.s32.f32 %v518_v32  ;;  %v556_v59 = vcvt.s32.f32 %v524_v60  ;;  %v583_v42 = vadd.f32 %v551_v37, %v447_v24 }
  0x73   :  { %v584_v19 = vadd.f32 %v552_v55, %v448_v25  ;;  %v585_v17 = vadd.f32 %v553_v53, %v449_v38  ;;  %v586_v29 = vadd.f32 %v554_v45, %v450_v56  ;;  %v587_v0 = vadd.f32 %v555_v3, %v451_v11 }
  0x74   :  { %v581_v16 = vadd.f32 %v549_v57, %v445_v33  ;;  %v582_v18 = vadd.f32 %v550_v39, %v446_v28  ;;  %v588_v62 = vadd.f32 %v556_v59, %v452_v36  ;;  %v615_v63 = vmul.f32 0.00390625, %v583_v42 }
  0x75   :  { %v616_v50 = vmul.f32 0.00390625, %v584_v19  ;;  %v617_v61 = vmul.f32 0.00390625, %v585_v17  ;;  %v618_v1 = vmul.f32 0.00390625, %v586_v29  ;;  %v619_v13 = vmul.f32 0.00390625, %v587_v0 }
  0x76   :  { %v613_v23 = vmul.f32 0.00390625, %v581_v16  ;;  %v614_v43 = vmul.f32 0.00390625, %v582_v18  ;;  %v620_v44 = vmul.f32 0.00390625, %v588_v62  ;;  %v647_v48 = vmul.f32 0.99999, %v615_v63 }
  0x77   :  { %v648_v52 = vmul.f32 0.99999, %v616_v50  ;;  %v649_v28 = vmul.f32 0.99999, %v617_v61  ;;  %v650_v24 = vmul.f32 0.99999, %v618_v1 }
  0x78   :  { %v645_v32 = vmul.f32 0.99999, %v613_v23  ;;  %v646_v34 = vmul.f32 0.99999, %v614_v43  ;;  %v651_v25 = vmul.f32 0.99999, %v619_v13 }
  0x79   :  { %v652_v56 = vmul.f32 0.99999, %v620_v44  ;;  %v679_v51 = vadd.f32 5e-06, %v647_v48  ;;  %v680_v60 = vadd.f32 5e-06, %v648_v52 }
  0x7a   :  { %v677_v11 = vadd.f32 5e-06, %v645_v32  ;;  %v678_v36 = vadd.f32 5e-06, %v646_v34  ;;  %v681_v57 = vadd.f32 5e-06, %v649_v28 }
  0x7b   :  { %v682_v37 = vadd.f32 5e-06, %v650_v24  ;;  %v683_v55 = vadd.f32 5e-06, %v651_v25  ;;  %v1500_v53 = vadd.f32 5e-06, %v652_v56 }
  0x7c   :  { %1113 = vlog2.f32 %v677_v11  ;;  %v773_v45 = vsub.f32 1.0, %v677_v11  ;;  %v774_v3 = vsub.f32 1.0, %v678_v36  ;;  %v775_v59 = vsub.f32 1.0, %v679_v51 }
  0x7d   :  { %1115 = vlog2.f32 %v678_v36  ;;  %v776_v16 = vsub.f32 1.0, %v680_v60  ;;  %v777_v18 = vsub.f32 1.0, %v681_v57  ;;  %v778_v42 = vsub.f32 1.0, %v682_v37 }
  0x7e   :  { %1117 = vlog2.f32 %v679_v51  ;;  %v779_v19 = vsub.f32 1.0, %v683_v55  ;;  %v780_v17 = vsub.f32 1.0, %v1500_v53  ;;  %v58_v29 = vmul.u32 1024, %v1332_v14 }
  0x7f   :  { %1119 = vlog2.f32 %v680_v60 }
  0x80   :  { %1121 = vlog2.f32 %v681_v57  ;;  %v83_v43 = vadd.s32 %v58_v29, %v1302_v2  ;;  %v84_v63 = vadd.s32 %v58_v29, %v1305_v4  ;;  %v85_v50 = vadd.s32 %v58_v29, %v1308_v5 }
  0x81   :  { %1123 = vlog2.f32 %v682_v37  ;;  %v86_v61 = vadd.s32 %v58_v29, %v1311_v6  ;;  %v87_v1 = vadd.s32 %v58_v29, %v1314_v7  ;;  %v88_v14 = vadd.s32 %v58_v29, %v1317_v8 }
  0x82   :  { %1125 = vlog2.f32 %v683_v55  ;;  %v89_v13 = vadd.s32 %v58_v29, %v1320_v9  ;;  %v90_v44 = vadd.s32 %v58_v29, %v1323_v10  ;;  %v117_v32 = vadd.s32 %v1328_v12, %v83_v43 }
  0x83   :  { %1127 = vlog2.f32 %v1500_v53  ;;  %v118_v34 = vadd.s32 %v1328_v12, %v84_v63  ;;  %v119_v48 = vadd.s32 %v1328_v12, %v85_v50  ;;  %v120_v52 = vadd.s32 %v1328_v12, %v86_v61 }
  0x84   :  { %1129 = vlog2.f32 %v773_v45  ;;  %v121_v28 = vadd.s32 %v1328_v12, %v87_v1  ;;  %v122_v24 = vadd.s32 %v1328_v12, %v88_v14  ;;  %v123_v25 = vadd.s32 %v1328_v12, %v89_v13 }
  0x85   :  { %1131 = vlog2.f32 %v774_v3  ;;  %v124_v11 = vadd.s32 %v1328_v12, %v90_v44  ;;  %v149_v36 = vshrl.u32 %v117_v32, 16  ;;  %v150_v51 = vshrl.u32 %v118_v34, 16 }
  0x86   :  { %v1114_v56 = vpop.eup %1113  ;;  %1133 = vlog2.f32 %v775_v59  ;;  %v151_v37 = vshrl.u32 %v119_v48, 16  ;;  %v152_v55 = vshrl.u32 %v120_v52, 16  ;;  %v153_v3 = vshrl.u32 %v121_v28, 16 }
  0x87   :  { %v1116_v60 = vpop.eup %1115  ;;  %v1524_v57 = vmul.f32 0.6931472, %v1114_v56  ;;  %1135 = vlog2.f32 %v776_v16  ;;  %v154_v29 = vshrl.u32 %v122_v24, 16  ;;  %v155_v50 = vshrl.u32 %v123_v25, 16 }
  0x88   :  { %v1118_v53 = vpop.eup %1117  ;;  %v1526_v45 = vmul.f32 0.6931472, %v1116_v60  ;;  %1137 = vlog2.f32 %v777_v18  ;;  %v156_v14 = vshrl.u32 %v124_v11, 16  ;;  %v1537_v56 = vxor.u32 %v149_v36, %v117_v32 }
  0x89   :  { %v1120_v43 = vpop.eup %1119  ;;  %v1528_v63 = vmul.f32 0.6931472, %v1118_v53  ;;  %1139 = vlog2.f32 %v778_v42  ;;  %v933_v59 = vsub.f32 0.0, %v1524_v57  ;;  %v182_v23 = vxor.u32 %v150_v51, %v118_v34 }
  0x8a   :  { %v1122_v61 = vpop.eup %1121  ;;  %v1531_v1 = vmul.f32 0.6931472, %v1120_v43  ;;  %1141 = vlog2.f32 %v779_v19  ;;  %v934_v16 = vsub.f32 0.0, %v1526_v45  ;;  %v183_v43 = vxor.u32 %v151_v37, %v119_v48 }
  0x8b   :  { %v1124_v13 = vpop.eup %1123  ;;  %v1534_v44 = vmul.f32 0.6931472, %v1122_v61  ;;  %1143 = vlog2.f32 %v780_v17  ;;  %v935_v18 = vsub.f32 0.0, %v1528_v63  ;;  %v184_v39 = vxor.u32 %v152_v55, %v120_v52 }
  0x8c   :  { %1949 = vst [vmem:[#allocation26_spill] sm:$0xff] %v1531_v1  ;;  %v1126_v60 = vpop.eup %1125  ;;  %v1539_v42 = vmul.f32 0.6931472, %v1124_v13  ;;  %v936_v53 = vsub.f32 0.0, %v1531_v1  ;;  %v185_v61 = vxor.u32 %v153_v3, %v121_v28  ;;  %v186_v36 = vxor.u32 %v154_v29, %v122_v24 }
  0x8d   :  { %1950 = vst [vmem:[#allocation27_spill] sm:$0xff] %v1534_v44  ;;  %v1128_v62 = vpop.eup %1127  ;;  %v1542_v19 = vmul.f32 0.6931472, %v1126_v60  ;;  %v937_v0 = vsub.f32 0.0, %v1534_v44  ;;  %v187_v38 = vxor.u32 %v155_v50, %v123_v25  ;;  %v188_v48 = vxor.u32 %v156_v14, %v124_v11 }
  0x8e   :  { %1951 = vst [vmem:[#allocation28_spill] sm:$0xff] %v1539_v42  ;;  %v1130_v30 = vpop.eup %1129  ;;  %v1545_v17 = vmul.f32 0.6931472, %v1128_v62  ;;  %v938_v32 = vsub.f32 0.0, %v1539_v42  ;;  %v213_v51 = vmul.u32 2146121005, %v1537_v56 }
  0x8f   :  { %1952 = vst [vmem:[#allocation29_spill] sm:$0xff] %v1542_v19  ;;  %v1132_v13 = vpop.eup %1131  ;;  %v1548_v33 = vmul.f32 0.6931472, %v1130_v30  ;;  %v939_v34 = vsub.f32 0.0, %v1542_v19  ;;  %v214_v28 = vmul.u32 2146121005, %v182_v23 }
  0x90   :  { %1953 = vst [vmem:[#allocation30_spill] sm:$0xff] %v1545_v17  ;;  %v1134_v37 = vpop.eup %1133  ;;  %v1552_v60 = vmul.f32 0.6931472, %v1132_v13  ;;  %v940_v52 = vsub.f32 0.0, %v1545_v17  ;;  %v215_v30 = vmul.u32 2146121005, %v183_v43 }
  0x91   :  { %v1136_v55 = vpop.eup %1135  ;;  %v1556_v3 = vmul.f32 0.6931472, %v1134_v37  ;;  %v965_v24 = vsub.f32 %v933_v59, %v1548_v33  ;;  %v216_v25 = vmul.u32 2146121005, %v184_v39  ;;  %v217_v14 = vmul.u32 2146121005, %v185_v61 }
  0x92   :  { %v1138_v29 = vpop.eup %1137  ;;  %v1559_v50 = vmul.f32 0.6931472, %v1136_v55  ;;  %v966_v11 = vsub.f32 %v934_v16, %v1552_v60  ;;  %v218_v56 = vmul.u32 2146121005, %v186_v36  ;;  %v219_v62 = vmul.u32 2146121005, %v187_v38 }
  0x93   :  { %v1140_v13 = vpop.eup %1139  ;;  %v1562_v49 = vmul.f32 0.6931472, %v1138_v29  ;;  %v967_v23 = vsub.f32 %v935_v18, %v1556_v3  ;;  %v220_v58 = vmul.u32 2146121005, %v188_v48  ;;  %v245_v43 = vshrl.u32 %v213_v51, 15 }
  0x94   :  { %v1142_v37 = vpop.eup %1141  ;;  %v1565_v54 = vmul.f32 0.6931472, %v1140_v13  ;;  %v968_v59 = vsub.f32 %v936_v53, %v1559_v50  ;;  %v997_v39 = vadd.f32 %v966_v11, %v965_v24  ;;  %v246_v61 = vshrl.u32 %v214_v28, 15 }
  0x95   :  { %1954 = vst [vmem:[#allocation31_spill] sm:$0xff] %v1562_v49  ;;  %v1144_v55 = vpop.eup %1143  ;;  %v1568_v35 = vmul.f32 0.6931472, %v1142_v37  ;;  %v969_v16 = vsub.f32 %v937_v0, %v1562_v49  ;;  %v247_v36 = vshrl.u32 %v215_v30, 15  ;;  %v248_v48 = vshrl.u32 %v216_v25, 15 }
  0x96   :  { %1955 = vst [vmem:[#allocation32_spill] sm:$0xff] %v1565_v54  ;;  %v1571_v29 = vmul.f32 0.6931472, %v1144_v55  ;;  %v970_v18 = vsub.f32 %v938_v32, %v1565_v54  ;;  %v998_v38 = vadd.f32 %v997_v39, %v967_v23  ;;  %v249_v31 = vshrl.u32 %v217_v14, 15 }
  0x97   :  { %1956 = vst [vmem:[#allocation33_spill] sm:$0xff] %v1568_v35  ;;  %v971_v13 = vsub.f32 %v939_v34, %v1568_v35  ;;  %v250_v22 = vshrl.u32 %v218_v56, 15  ;;  %v251_v53 = vshrl.u32 %v219_v62, 15  ;;  %v252_v37 = vshrl.u32 %v220_v58, 15 }
  0x98   :  { %v972_v24 = vsub.f32 %v940_v52, %v1571_v29  ;;  %v999_v11 = vadd.f32 %v998_v38, %v968_v59  ;;  %v277_v17 = vxor.u32 %v245_v43, %v213_v51  ;;  %v278_v19 = vxor.u32 %v246_v61, %v214_v28 }
  0x99   :  { %v279_v0 = vxor.u32 %v247_v36, %v215_v30  ;;  %v280_v42 = vxor.u32 %v248_v48, %v216_v25  ;;  %v281_v44 = vxor.u32 %v249_v31, %v217_v14  ;;  %v282_v49 = vxor.u32 %v250_v22, %v218_v56 }
  0x9a   :  { %v1000_v55 = vadd.f32 %v999_v11, %v969_v16  ;;  %v283_v1 = vxor.u32 %v251_v53, %v219_v62  ;;  %v284_v32 = vxor.u32 %v252_v37, %v220_v58  ;;  %v309_v23 = vmul.u32 2221713035, %v277_v17 }
  0x9b   :  { %v310_v39 = vmul.u32 2221713035, %v278_v19  ;;  %v1957_v34 = vunpack.c.3.s8 %v1352_v40  ;;  %v1958_v54 = vunpack.c.3.s8 %v1354_v41  ;;  %v311_v51 = vmul.u32 2221713035, %v279_v0 }
  0x9c   :  { %v1001_v59 = vadd.f32 %v1000_v55, %v970_v18  ;;  %v312_v28 = vmul.u32 2221713035, %v280_v42  ;;  %v1959_v30 = vunpack.c.3.s8 %v1356_v46  ;;  %v313_v22 = vmul.u32 2221713035, %v281_v44 }
  0x9d   :  { %v1578_v35 = vand.u32 255, %v1957_v34  ;;  %v1582_v52 = vand.u32 255, %v1958_v54  ;;  %v314_v62 = vmul.u32 2221713035, %v282_v49  ;;  %v341_v58 = vshrl.u32 %v309_v23, 16 }
  0x9e   :  { %v1586_v31 = vand.u32 255, %v1959_v30  ;;  %v342_v17 = vshrl.u32 %v310_v39, 16  ;;  %v1002_v19 = vadd.f32 %v1001_v59, %v971_v13  ;;  %v315_v25 = vmul.u32 2221713035, %v283_v1 }
  0x9f   :  { %v316_v40 = vmul.u32 2221713035, %v284_v32  ;;  %v343_v14 = vshrl.u32 %v311_v51, 16  ;;  %v344_v56 = vshrl.u32 %v312_v28, 16  ;;  %v345_v43 = vshrl.u32 %v313_v22, 16 }
  0xa0   :  { %v346_v41 = vshrl.u32 %v314_v62, 16  ;;  %v373_v54 = vxor.u32 %v341_v58, %v309_v23  ;;  %v1003_v16 = vadd.f32 %v1002_v19, %v972_v24  ;;  %v347_v61 = vshrl.u32 %v315_v25, 16 }
  0xa1   :  { %v348_v36 = vshrl.u32 %v316_v40, 16  ;;  %v374_v42 = vxor.u32 %v342_v17, %v310_v39  ;;  %v375_v18 = vxor.u32 %v343_v14, %v311_v51  ;;  %v376_v46 = vxor.u32 %v344_v56, %v312_v28 }
  0xa2   :  { %v377_v38 = vxor.u32 %v345_v43, %v313_v22  ;;  %v378_v48 = vxor.u32 %v346_v41, %v314_v62  ;;  %1004 = vadd.xlane.f32.xlu0 %v1003_v16  ;;  %v379_v49 = vxor.u32 %v347_v61, %v315_v25  ;;  %v405_v53 = vshrl.u32 %v373_v54, 8 }
  0xa3   :  { %v380_v44 = vxor.u32 %v348_v36, %v316_v40  ;;  %v406_v13 = vshrl.u32 %v374_v42, 8  ;;  %v407_v1 = vshrl.u32 %v375_v18, 8  ;;  %v408_v11 = vshrl.u32 %v376_v46, 8 }
  0xa4   :  { %v409_v37 = vshrl.u32 %v377_v38, 8  ;;  %v410_v0 = vshrl.u32 %v378_v48, 8  ;;  %v411_v55 = vshrl.u32 %v379_v49, 8  ;;  %v437_v23 = vcvt.s32.f32 %v405_v53 }
  0xa5   :  { %v412_v32 = vshrl.u32 %v380_v44, 8  ;;  %v438_v24 = vcvt.s32.f32 %v406_v13  ;;  %v439_v34 = vcvt.s32.f32 %v407_v1  ;;  %v440_v59 = vcvt.s32.f32 %v408_v11 }
  0xa6   :  { %v441_v39 = vcvt.s32.f32 %v409_v37  ;;  %v442_v51 = vcvt.s32.f32 %v410_v0  ;;  %v443_v28 = vcvt.s32.f32 %v411_v55  ;;  %v469_v22 = vmul.f32 5.9604645e-08, %v437_v23 }
  0xa7   :  { %v444_v30 = vcvt.s32.f32 %v412_v32  ;;  %v470_v62 = vmul.f32 5.9604645e-08, %v438_v24  ;;  %v471_v58 = vmul.f32 5.9604645e-08, %v439_v34  ;;  %v472_v17 = vmul.f32 5.9604645e-08, %v440_v59 }
  0xa8   :  { %v473_v19 = vmul.f32 5.9604645e-08, %v441_v39  ;;  %v474_v25 = vmul.f32 5.9604645e-08, %v442_v51  ;;  %v475_v40 = vmul.f32 5.9604645e-08, %v443_v28  ;;  %v1960_v56 = vunpack.c.3.s8 %v1358_v47 }
  0xa9   :  { %v476_v14 = vmul.f32 5.9604645e-08, %v444_v30  ;;  %v1961_v41 = vunpack.c.3.s8 %v1364_v20  ;;  %v1962_v16 = vunpack.c.3.s8 %v1366_v21  ;;  %v1963_v36 = vunpack.c.3.s8 %v1368_v26 }
  0xaa   :  { %v544_v43 = vand.u32 255, %v1960_v56  ;;  %v1964_v18 = vunpack.c.3.s8 %v1370_v27  ;;  %v573_v38 = vcvt.s32.f32 %v1578_v35  ;;  %v574_v48 = vcvt.s32.f32 %v1582_v52 }
  0xab   :  { %v545_v54 = vand.u32 255, %v1961_v41  ;;  %v546_v61 = vand.u32 255, %v1962_v16  ;;  %v547_v42 = vand.u32 255, %v1963_v36  ;;  %v575_v49 = vcvt.s32.f32 %v1586_v31  ;;  %v1607_v41 = vld [vmem:[#allocation4 + $0x10] sm:$0xff] }
  0xac   :  { %v548_v46 = vand.u32 255, %v1964_v18  ;;  %v576_v47 = vcvt.s32.f32 %v544_v43  ;;  %v605_v1 = vadd.f32 %v573_v38, %v469_v22  ;;  %v606_v21 = vadd.f32 %v574_v48, %v470_v62  ;;  %v1601_v22 = vld [vmem:[#allocation4] sm:$0xff] }
  0xad   :  { %v577_v44 = vcvt.s32.f32 %v545_v54  ;;  %v578_v53 = vcvt.s32.f32 %v546_v61  ;;  %v579_v20 = vcvt.s32.f32 %v547_v42  ;;  %v607_v11 = vadd.f32 %v575_v49, %v471_v58  ;;  %v1610_v42 = vld [vmem:[#allocation4 + $0x18] sm:$0xff] }
  0xae   :  { %v580_v13 = vcvt.s32.f32 %v548_v46  ;;  %v608_v37 = vadd.f32 %v576_v47, %v472_v17  ;;  %v637_v32 = vmul.f32 0.00390625, %v605_v1  ;;  %v638_v23 = vmul.f32 0.00390625, %v606_v21 }
  0xaf   :  { %v609_v26 = vadd.f32 %v577_v44, %v473_v19  ;;  %v610_v0 = vadd.f32 %v578_v53, %v474_v25  ;;  %v611_v55 = vadd.f32 %v579_v20, %v475_v40  ;;  %v639_v35 = vmul.f32 0.00390625, %v607_v11  ;;  %v1604_v25 = vld [vmem:[#allocation4 + $0x8] sm:$0xff] }
  0xb0   :  { %v612_v27 = vadd.f32 %v580_v13, %v476_v14  ;;  %v640_v24 = vmul.f32 0.00390625, %v608_v37  ;;  %v669_v39 = vmul.f32 0.99999, %v637_v32  ;;  %v670_v51 = vmul.f32 0.99999, %v638_v23  ;;  %v1620_v37 = vld [vmem:[#allocation4 + $0x20] sm:$0xff] }
  0xb1   :  { %v641_v52 = vmul.f32 0.00390625, %v609_v26  ;;  %v642_v34 = vmul.f32 0.00390625, %v610_v0  ;;  %v643_v31 = vmul.f32 0.00390625, %v611_v55  ;;  %v671_v28 = vmul.f32 0.99999, %v639_v35  ;;  %v1623_v0 = vld [vmem:[#allocation4 + $0x28] sm:$0xff] }
  0xb2   :  { %v644_v59 = vmul.f32 0.00390625, %v612_v27  ;;  %v672_v30 = vmul.f32 0.99999, %v640_v24  ;;  %v701_v56 = vadd.f32 5e-06, %v669_v39  ;;  %v56_v11 = vmul.u32 1024, %v1334_v15 }
  0xb3   :  { %v673_v58 = vmul.f32 0.99999, %v641_v52  ;;  %v674_v17 = vmul.f32 0.99999, %v642_v34  ;;  %v675_v19 = vmul.f32 0.99999, %v643_v31 }
  0xb4   :  { %v676_v14 = vmul.f32 0.99999, %v644_v59  ;;  %v702_v43 = vadd.f32 5e-06, %v670_v51  ;;  %v703_v16 = vadd.f32 5e-06, %v671_v28  ;;  %1145 = vlog2.f32 %v701_v56 }
  0xb5   :  { %v704_v61 = vadd.f32 5e-06, %v672_v30  ;;  %v705_v36 = vadd.f32 5e-06, %v673_v58  ;;  %v706_v46 = vadd.f32 5e-06, %v674_v17  ;;  %v67_v23 = vadd.s32 %v56_v11, %v1302_v2 }
  0xb6   :  { %v1613_v38 = vadd.f32 5e-06, %v675_v19  ;;  %v1615_v48 = vadd.f32 5e-06, %v676_v14  ;;  %1147 = vlog2.f32 %v702_v43  ;;  %v797_v49 = vsub.f32 1.0, %v701_v56  ;;  %v1626_v27 = vld [vmem:[#allocation4 + $0x30] sm:$0xff] }
  0xb7   :  { %v798_v47 = vsub.f32 1.0, %v702_v43  ;;  %v799_v44 = vsub.f32 1.0, %v703_v16  ;;  %1149 = vlog2.f32 %v703_v16  ;;  %v800_v53 = vsub.f32 1.0, %v704_v61 }
  0xb8   :  { %v801_v20 = vsub.f32 1.0, %v705_v36  ;;  %v802_v13 = vsub.f32 1.0, %v706_v46  ;;  %1151 = vlog2.f32 %v704_v61  ;;  %v803_v1 = vsub.f32 1.0, %v1613_v38 }
  0xb9   :  { %v804_v21 = vsub.f32 1.0, %v1615_v48  ;;  %1153 = vlog2.f32 %v705_v36  ;;  %v68_v35 = vadd.s32 %v56_v11, %v1305_v4  ;;  %v69_v15 = vadd.s32 %v56_v11, %v1308_v5 }
  0xba   :  { %1155 = vlog2.f32 %v706_v46  ;;  %v70_v24 = vadd.s32 %v56_v11, %v1311_v6  ;;  %v71_v52 = vadd.s32 %v56_v11, %v1314_v7  ;;  %v72_v34 = vadd.s32 %v56_v11, %v1317_v8 }
  0xbb   :  { %1157 = vlog2.f32 %v1613_v38  ;;  %v73_v31 = vadd.s32 %v56_v11, %v1320_v9  ;;  %v74_v59 = vadd.s32 %v56_v11, %v1323_v10  ;;  %v101_v2 = vadd.s32 %v1328_v12, %v67_v23 }
  0xbc   :  { %1159 = vlog2.f32 %v1615_v48  ;;  %v102_v4 = vadd.s32 %v1328_v12, %v68_v35  ;;  %v103_v5 = vadd.s32 %v1328_v12, %v69_v15  ;;  %v104_v39 = vadd.s32 %v1328_v12, %v70_v24 }
  0xbd   :  { %1161 = vlog2.f32 %v797_v49  ;;  %v105_v6 = vadd.s32 %v1328_v12, %v71_v52  ;;  %v106_v7 = vadd.s32 %v1328_v12, %v72_v34  ;;  %v107_v8 = vadd.s32 %v1328_v12, %v73_v31 }
  0xbe   :  { %1163 = vlog2.f32 %v798_v47  ;;  %v1146_v51 = vpop.eup %1145  ;;  %v108_v9 = vadd.s32 %v1328_v12, %v74_v59  ;;  %v133_v10 = vshrl.u32 %v101_v2, 16  ;;  %v134_v28 = vshrl.u32 %v102_v4, 16 }
  0xbf   :  { %1165 = vlog2.f32 %v799_v44  ;;  %v1647_v58 = vmul.f32 0.6931472, %v1146_v51  ;;  %v135_v17 = vshrl.u32 %v103_v5, 16  ;;  %v136_v19 = vshrl.u32 %v104_v39, 16 }
  0xc0   :  { %v1148_v30 = vpop.eup %1147  ;;  %1167 = vlog2.f32 %v800_v53  ;;  %v137_v43 = vshrl.u32 %v105_v6, 16  ;;  %v138_v16 = vshrl.u32 %v106_v7, 16  ;;  %v139_v46 = vshrl.u32 %v107_v8, 16 }
  0xc1   :  { %v1150_v14 = vpop.eup %1149  ;;  %v1649_v56 = vmul.f32 0.6931472, %v1148_v30  ;;  %1169 = vlog2.f32 %v801_v20  ;;  %v957_v12 = vsub.f32 0.0, %v1647_v58  ;;  %v140_v47 = vshrl.u32 %v108_v9, 16 }
  0xc2   :  { %v1152_v61 = vpop.eup %1151  ;;  %v1651_v36 = vmul.f32 0.6931472, %v1150_v14  ;;  %1171 = vlog2.f32 %v802_v13  ;;  %v1660_v11 = vxor.u32 %v133_v10, %v101_v2  ;;  %v166_v15 = vxor.u32 %v134_v28, %v102_v4 }
  0xc3   :  { %v1154_v38 = vpop.eup %1153  ;;  %v1654_v48 = vmul.f32 0.6931472, %v1152_v61  ;;  %1173 = vlog2.f32 %v803_v1  ;;  %v958_v49 = vsub.f32 0.0, %v1649_v56  ;;  %v167_v24 = vxor.u32 %v135_v17, %v103_v5 }
  0xc4   :  { %v1156_v44 = vpop.eup %1155  ;;  %v1657_v53 = vmul.f32 0.6931472, %v1154_v38  ;;  %1175 = vlog2.f32 %v804_v21  ;;  %v959_v20 = vsub.f32 0.0, %v1651_v36  ;;  %v168_v31 = vxor.u32 %v136_v19, %v104_v39  ;;  %v1678_v19 = vld [vmem:[#allocation4 + $0x38] sm:$0xff] }
  0xc5   :  { %v1158_v23 = vpop.eup %1157  ;;  %v1662_v13 = vmul.f32 0.6931472, %v1156_v44  ;;  %v960_v35 = vsub.f32 0.0, %v1654_v48  ;;  %v169_v59 = vxor.u32 %v137_v43, %v105_v6  ;;  %v170_v10 = vxor.u32 %v138_v16, %v106_v7 }
  0xc6   :  { %1965 = vst [vmem:[#allocation34_spill] sm:$0xff] %v1657_v53  ;;  %v1160_v52 = vpop.eup %1159  ;;  %v1665_v1 = vmul.f32 0.6931472, %v1158_v23  ;;  %v961_v34 = vsub.f32 0.0, %v1657_v53  ;;  %v171_v30 = vxor.u32 %v139_v46, %v107_v8  ;;  %v172_v5 = vxor.u32 %v140_v47, %v108_v9 }
  0xc7   :  { %1966 = vst [vmem:[#allocation35_spill] sm:$0xff] %v1662_v13  ;;  %v1162_v51 = vpop.eup %1161  ;;  %v1668_v21 = vmul.f32 0.6931472, %v1160_v52  ;;  %v962_v2 = vsub.f32 0.0, %v1662_v13  ;;  %v197_v28 = vmul.u32 2146121005, %v1660_v11 }
  0xc8   :  { %1967 = vst [vmem:[#allocation36_spill] sm:$0xff] %v1665_v1  ;;  %v1164_v14 = vpop.eup %1163  ;;  %v1671_v61 = vmul.f32 0.6931472, %v1162_v51  ;;  %v963_v4 = vsub.f32 0.0, %v1665_v1  ;;  %v198_v6 = vmul.u32 2146121005, %v166_v15 }
  0xc9   :  { %1968 = vst [vmem:[#allocation37_spill] sm:$0xff] %v1668_v21  ;;  %v1166_v17 = vpop.eup %1165  ;;  %v1675_v38 = vmul.f32 0.6931472, %v1164_v14  ;;  %v964_v39 = vsub.f32 0.0, %v1668_v21  ;;  %v199_v46 = vmul.u32 2146121005, %v167_v24 }
  0xca   :  { %v1168_v7 = vpop.eup %1167  ;;  %v1681_v8 = vmul.f32 0.6931472, %v1166_v17  ;;  %v989_v16 = vsub.f32 %v957_v12, %v1671_v61  ;;  %v200_v44 = vmul.u32 2146121005, %v168_v31  ;;  %v201_v23 = vmul.u32 2146121005, %v169_v59 }
  0xcb   :  { %v1170_v9 = vpop.eup %1169  ;;  %v1684_v47 = vmul.f32 0.6931472, %v1168_v7  ;;  %v990_v11 = vsub.f32 %v958_v49, %v1675_v38  ;;  %v202_v52 = vmul.u32 2146121005, %v170_v10  ;;  %v203_v43 = vmul.u32 2146121005, %v171_v30 }
  0xcc   :  { %v1172_v51 = vpop.eup %1171  ;;  %v1687_v15 = vmul.f32 0.6931472, %v1170_v9  ;;  %v991_v14 = vsub.f32 %v959_v20, %v1681_v8  ;;  %v204_v32 = vmul.u32 2146121005, %v172_v5  ;;  %v229_v31 = vshrl.u32 %v197_v28, 15 }
  0xcd   :  { %v1174_v17 = vpop.eup %1173  ;;  %v1690_v55 = vmul.f32 0.6931472, %v1172_v51  ;;  %v992_v12 = vsub.f32 %v960_v35, %v1684_v47  ;;  %v1024_v24 = vadd.f32 %v990_v11, %v989_v16  ;;  %v230_v59 = vshrl.u32 %v198_v6, 15 }
  0xce   :  { %v1176_v7 = vpop.eup %1175  ;;  %v1693_v26 = vmul.f32 0.6931472, %v1174_v17  ;;  %v993_v49 = vsub.f32 %v961_v34, %v1687_v15  ;;  %v231_v10 = vshrl.u32 %v199_v46, 15  ;;  %v232_v5 = vshrl.u32 %v200_v44, 15 }
  0xcf   :  { %1969 = vst [vmem:[#allocation38_spill] sm:$0xff] %v1690_v55  ;;  %v1696_v9 = vmul.f32 0.6931472, %v1176_v7  ;;  %v994_v20 = vsub.f32 %v962_v2, %v1690_v55  ;;  %v1025_v30 = vadd.f32 %v1024_v24, %v991_v14  ;;  %v233_v18 = vshrl.u32 %v201_v23, 15 }
  0xd0   :  { %1970 = vst [vmem:[#allocation39_spill] sm:$0xff] %v1693_v26  ;;  %v995_v51 = vsub.f32 %v963_v4, %v1693_v26  ;;  %v234_v54 = vshrl.u32 %v202_v52, 15  ;;  %v235_v35 = vshrl.u32 %v203_v43, 15  ;;  %v236_v17 = vshrl.u32 %v204_v32, 15 }
  0xd1   :  { %v996_v16 = vsub.f32 %v964_v39, %v1696_v9  ;;  %v1026_v11 = vadd.f32 %v1025_v30, %v992_v12  ;;  %v261_v40 = vxor.u32 %v229_v31, %v197_v28  ;;  %v262_v62 = vxor.u32 %v230_v59, %v198_v6 }
  0xd2   :  { %v263_v34 = vxor.u32 %v231_v10, %v199_v46  ;;  %v264_v21 = vxor.u32 %v232_v5, %v200_v44  ;;  %v265_v1 = vxor.u32 %v233_v18, %v201_v23  ;;  %v266_v13 = vxor.u32 %v234_v54, %v202_v52 }
  0xd3   :  { %v1027_v7 = vadd.f32 %v1026_v11, %v993_v49  ;;  %v267_v53 = vxor.u32 %v235_v35, %v203_v43  ;;  %v268_v2 = vxor.u32 %v236_v17, %v204_v32  ;;  %v293_v14 = vmul.u32 2221713035, %v261_v40 }
  0xd4   :  { %v294_v24 = vmul.u32 2221713035, %v262_v62  ;;  %v1971_v4 = vunpack.c.1.s8 %v1601_v22  ;;  %v1972_v55 = vunpack.c.1.s8 %v1604_v25  ;;  %v295_v28 = vmul.u32 2221713035, %v263_v34 }
  0xd5   :  { %v1028_v12 = vadd.f32 %v1027_v7, %v994_v20  ;;  %v296_v6 = vmul.u32 2221713035, %v264_v21  ;;  %v1973_v46 = vunpack.c.1.s8 %v1607_v41  ;;  %v297_v54 = vmul.u32 2221713035, %v265_v1 }
  0xd6   :  { %v1703_v26 = vand.u32 255, %v1971_v4  ;;  %v1707_v39 = vand.u32 255, %v1972_v55  ;;  %v298_v43 = vmul.u32 2221713035, %v266_v13  ;;  %v325_v32 = vshrl.u32 %v293_v14, 16 }
  0xd7   :  { %v1711_v18 = vand.u32 255, %v1973_v46  ;;  %v326_v40 = vshrl.u32 %v294_v24, 16  ;;  %v1029_v62 = vadd.f32 %v1028_v12, %v995_v51  ;;  %v299_v44 = vmul.u32 2221713035, %v267_v53 }
  0xd8   :  { %v300_v22 = vmul.u32 2221713035, %v268_v2  ;;  %v327_v23 = vshrl.u32 %v295_v28, 16  ;;  %v328_v52 = vshrl.u32 %v296_v6, 16  ;;  %v329_v31 = vshrl.u32 %v297_v54, 16 }
  0xd9   :  { %v330_v25 = vshrl.u32 %v298_v43, 16  ;;  %v357_v55 = vxor.u32 %v325_v32, %v293_v14  ;;  %v1030_v49 = vadd.f32 %v1029_v62, %v996_v16  ;;  %v331_v59 = vshrl.u32 %v299_v44, 16 }
  0xda   :  { %v332_v10 = vshrl.u32 %v300_v22, 16  ;;  %v358_v21 = vxor.u32 %v326_v40, %v294_v24  ;;  %v359_v20 = vxor.u32 %v327_v23, %v295_v28  ;;  %v360_v41 = vxor.u32 %v328_v52, %v296_v6 }
  0xdb   :  { %v361_v30 = vxor.u32 %v329_v31, %v297_v54  ;;  %v362_v5 = vxor.u32 %v330_v25, %v298_v43  ;;  %1031 = vadd.xlane.f32.xlu1 %v1030_v49  ;;  %v363_v13 = vxor.u32 %v331_v59, %v299_v44  ;;  %v389_v35 = vshrl.u32 %v357_v55, 8 }
  0xdc   :  { %v364_v1 = vxor.u32 %v332_v10, %v300_v22  ;;  %v390_v51 = vshrl.u32 %v358_v21, 8  ;;  %v391_v53 = vshrl.u32 %v359_v20, 8  ;;  %v392_v11 = vshrl.u32 %v360_v41, 8 }
  0xdd   :  { %v393_v17 = vshrl.u32 %v361_v30, 8  ;;  %v394_v34 = vshrl.u32 %v362_v5, 8  ;;  %v395_v7 = vshrl.u32 %v363_v13, 8  ;;  %v421_v14 = vcvt.s32.f32 %v389_v35 }
  0xde   :  { %v396_v2 = vshrl.u32 %v364_v1, 8  ;;  %v422_v16 = vcvt.s32.f32 %v390_v51  ;;  %v423_v4 = vcvt.s32.f32 %v391_v53  ;;  %v424_v12 = vcvt.s32.f32 %v392_v11 }
  0xdf   :  { %v425_v24 = vcvt.s32.f32 %v393_v17  ;;  %v426_v28 = vcvt.s32.f32 %v394_v34  ;;  %v427_v6 = vcvt.s32.f32 %v395_v7  ;;  %v453_v54 = vmul.f32 5.9604645e-08, %v421_v14 }
  0xe0   :  { %v428_v46 = vcvt.s32.f32 %v396_v2  ;;  %v454_v43 = vmul.f32 5.9604645e-08, %v422_v16  ;;  %v455_v32 = vmul.f32 5.9604645e-08, %v423_v4  ;;  %v456_v40 = vmul.f32 5.9604645e-08, %v424_v12 }
  0xe1   :  { %v457_v62 = vmul.f32 5.9604645e-08, %v425_v24  ;;  %v458_v44 = vmul.f32 5.9604645e-08, %v426_v28  ;;  %v459_v22 = vmul.f32 5.9604645e-08, %v427_v6  ;;  %v1974_v52 = vunpack.c.1.s8 %v1610_v42 }
  0xe2   :  { %v460_v23 = vmul.f32 5.9604645e-08, %v428_v46  ;;  %v1975_v25 = vunpack.c.1.s8 %v1620_v37  ;;  %v1976_v49 = vunpack.c.1.s8 %v1623_v0  ;;  %v1977_v10 = vunpack.c.1.s8 %v1626_v27 }
  0xe3   :  { %v528_v31 = vand.u32 255, %v1974_v52  ;;  %v1978_v20 = vunpack.c.1.s8 %v1678_v19  ;;  %v557_v30 = vcvt.s32.f32 %v1703_v26  ;;  %v558_v5 = vcvt.s32.f32 %v1707_v39 }
  0xe4   :  { %v529_v55 = vand.u32 255, %v1975_v25  ;;  %v530_v59 = vand.u32 255, %v1976_v49  ;;  %v531_v21 = vand.u32 255, %v1977_v10  ;;  %v559_v13 = vcvt.s32.f32 %v1711_v18 }
  0xe5   :  { %v532_v41 = vand.u32 255, %v1978_v20  ;;  %v560_v42 = vcvt.s32.f32 %v528_v31  ;;  %v589_v53 = vadd.f32 %v557_v30, %v453_v54  ;;  %v590_v0 = vadd.f32 %v558_v5, %v454_v43 }
  0xe6   :  { %v561_v1 = vcvt.s32.f32 %v529_v55  ;;  %v562_v35 = vcvt.s32.f32 %v530_v59  ;;  %v563_v37 = vcvt.s32.f32 %v531_v21  ;;  %v591_v11 = vadd.f32 %v559_v13, %v455_v32 }
  0xe7   :  { %v564_v51 = vcvt.s32.f32 %v532_v41  ;;  %v592_v17 = vadd.f32 %v560_v42, %v456_v40  ;;  %v621_v2 = vmul.f32 0.00390625, %v589_v53  ;;  %v622_v14 = vmul.f32 0.00390625, %v590_v0 }
  0xe8   :  { %v593_v27 = vadd.f32 %v561_v1, %v457_v62  ;;  %v594_v34 = vadd.f32 %v562_v35, %v458_v44  ;;  %v595_v7 = vadd.f32 %v563_v37, %v459_v22  ;;  %v623_v26 = vmul.f32 0.00390625, %v591_v11 }
  0xe9   :  { %v596_v19 = vadd.f32 %v564_v51, %v460_v23  ;;  %v624_v16 = vmul.f32 0.00390625, %v592_v17  ;;  %v653_v24 = vmul.f32 0.99999, %v621_v2  ;;  %v654_v28 = vmul.f32 0.99999, %v622_v14 }
  0xea   :  { %v625_v39 = vmul.f32 0.00390625, %v593_v27  ;;  %v626_v4 = vmul.f32 0.00390625, %v594_v34  ;;  %v627_v18 = vmul.f32 0.00390625, %v595_v7  ;;  %v655_v6 = vmul.f32 0.99999, %v623_v26 }
  0xeb   :  { %v628_v12 = vmul.f32 0.00390625, %v596_v19  ;;  %v656_v46 = vmul.f32 0.99999, %v624_v16  ;;  %v685_v40 = vadd.f32 5e-06, %v653_v24 }
  0xec   :  { %v657_v54 = vmul.f32 0.99999, %v625_v39  ;;  %v658_v43 = vmul.f32 0.99999, %v626_v4  ;;  %v659_v32 = vmul.f32 0.99999, %v627_v18 }
  0xed   :  { %v686_v62 = vadd.f32 5e-06, %v654_v28  ;;  %v660_v44 = vmul.f32 0.99999, %v628_v12  ;;  %v687_v22 = vadd.f32 5e-06, %v655_v6  ;;  %1177 = vlog2.f32 %v685_v40 }
  0xee   :  { %v688_v23 = vadd.f32 5e-06, %v656_v46  ;;  %v689_v52 = vadd.f32 5e-06, %v657_v54  ;;  %v690_v31 = vadd.f32 5e-06, %v658_v43 }
  0xef   :  { %1179 = vlog2.f32 %v686_v62  ;;  %v691_v25 = vadd.f32 5e-06, %v659_v32  ;;  %v692_v55 = vadd.f32 5e-06, %v660_v44  ;;  %v781_v49 = vsub.f32 1.0, %v685_v40 }
  0xf0   :  { %1181 = vlog2.f32 %v687_v22  ;;  %v782_v59 = vsub.f32 1.0, %v686_v62  ;;  %v783_v10 = vsub.f32 1.0, %v687_v22  ;;  %v784_v21 = vsub.f32 1.0, %v688_v23 }
  0xf1   :  { %1183 = vlog2.f32 %v688_v23  ;;  %v785_v20 = vsub.f32 1.0, %v689_v52  ;;  %v786_v41 = vsub.f32 1.0, %v690_v31  ;;  %v787_v5 = vsub.f32 1.0, %v691_v25 }
  0xf2   :  { %1185 = vlog2.f32 %v689_v52  ;;  %v788_v42 = vsub.f32 1.0, %v692_v55 }
  0xf3   :  { %1187 = vlog2.f32 %v690_v31 }
  0xf4   :  { %1189 = vlog2.f32 %v691_v25 }
  0xf5   :  { %1191 = vlog2.f32 %v692_v55 }
  0xf6   :  { %1193 = vlog2.f32 %v781_v49 }
  0xf7   :  { %1195 = vlog2.f32 %v782_v59  ;;  %v1178_v30 = vpop.eup %1177 }
  0xf8   :  { %1197 = vlog2.f32 %v783_v10  ;;  %v1726_v37 = vmul.f32 0.6931472, %v1178_v30 }
  0xf9   :  { %v1180_v13 = vpop.eup %1179  ;;  %1199 = vlog2.f32 %v784_v21 }
  0xfa   :  { %v1182_v1 = vpop.eup %1181  ;;  %1201 = vlog2.f32 %v785_v20  ;;  %v1728_v53 = vmul.f32 0.6931472, %v1180_v13  ;;  %v941_v7 = vsub.f32 0.0, %v1726_v37 }
  0xfb   :  { %v1184_v35 = vpop.eup %1183  ;;  %1203 = vlog2.f32 %v786_v41  ;;  %v1730_v11 = vmul.f32 0.6931472, %v1182_v1 }
  0xfc   :  { %v1186_v51 = vpop.eup %1185  ;;  %1205 = vlog2.f32 %v787_v5  ;;  %v1732_v27 = vmul.f32 0.6931472, %v1184_v35  ;;  %v942_v14 = vsub.f32 0.0, %v1728_v53 }
  0xfd   :  { %v1188_v0 = vpop.eup %1187  ;;  %1207 = vlog2.f32 %v788_v42  ;;  %v1735_v2 = vmul.f32 0.6931472, %v1186_v51  ;;  %v943_v39 = vsub.f32 0.0, %v1730_v11 }
  0xfe   :  { %v1190_v17 = vpop.eup %1189  ;;  %v1741_v18 = vmul.f32 0.6931472, %v1188_v0  ;;  %v944_v24 = vsub.f32 0.0, %v1732_v27 }
  0xff   :  { %v1192_v34 = vpop.eup %1191  ;;  %v1749_v43 = vmul.f32 0.6931472, %v1190_v17  ;;  %v945_v40 = vsub.f32 0.0, %v1735_v2 }
 0x100   :  { %v1194_v19 = vpop.eup %1193  ;;  %v1755_v22 = vmul.f32 0.6931472, %v1192_v34  ;;  %v946_v55 = vsub.f32 0.0, %v1741_v18 }
 0x101   :  { %v1196_v26 = vpop.eup %1195  ;;  %v1738_v16 = vmul.f32 0.6931472, %v1194_v19  ;;  %v947_v20 = vsub.f32 0.0, %v1749_v43  ;;  %v1266_v19 = vmov 0.0  }
 0x102   :  { %v1198_v4 = vpop.eup %1197  ;;  %v1743_v12 = vmul.f32 0.6931472, %v1196_v26  ;;  %v948_v13 = vsub.f32 0.0, %v1755_v22  ;;  %1038 = vst.msk [vmem:[%s1900_s3] sm:$0xff] %vm1037_vm0, %v1266_v19  ;;  %1039 = vst.msk [vmem:[%s1900_s3 + $0x8] sm:$0xff] %vm1037_vm0, %v1266_v19 }
 0x103   :  { %v1200_v28 = vpop.eup %1199  ;;  %v1746_v6 = vmul.f32 0.6931472, %v1198_v4  ;;  %v973_v46 = vsub.f32 %v941_v7, %v1738_v16  ;;  %1040 = vst.msk [vmem:[%s1900_s3 + $0x10] sm:$0xff] %vm1037_vm0, %v1266_v19  ;;  %1041 = vst.msk [vmem:[%s1900_s3 + $0x18] sm:$0xff] %vm1037_vm0, %v1266_v19  ;;  %v869_v4 = vsub.f32 %v1524_v57, %v1548_v33  ;;  %v1986_v33 = vld [vmem:[#allocation30_spill] sm:$0xff]  ;;  %v895_v19 = vsub.f32 %v1651_v36, %v1681_v8  ;;  %v2008_v8 = vld [vmem:[#allocation37_spill] sm:$0xff] }
 0x104   :  { %v1202_v54 = vpop.eup %1201  ;;  %v1751_v32 = vmul.f32 0.6931472, %v1200_v28  ;;  %v974_v62 = vsub.f32 %v942_v14, %v1743_v12  ;;  %v1023_v14 = vpop.xlane.xlu1 %1022  ;;  %v871_v28 = vsub.f32 %v1528_v63, %v1556_v3  ;;  %v876_v57 = vsub.f32 %v1986_v33, %v1571_v29 }
 0x105   :  { %v1204_v44 = vpop.eup %1203  ;;  %v1757_v23 = vmul.f32 0.6931472, %v1202_v54  ;;  %v975_v52 = vsub.f32 %v943_v39, %v1746_v6  ;;  %v878_v63 = vsub.f32 %v1728_v53, %v1743_v12  ;;  %901 = vst [vmem:[#allocation7] sm:$0xff] %v869_v4  ;;  %v1989_v12 = vld [vmem:[#allocation19_spill] sm:$0xff]  ;;  %v2004_v4 = vld [vmem:[#allocation38_spill] sm:$0xff]  ;;  %927 = vst [vmem:[#allocation7 + $0xd0] sm:$0xff] %v895_v19 }
 0x106   :  { %v1206_v31 = vpop.eup %1205  ;;  %v1760_v25 = vmul.f32 0.6931472, %v1204_v44  ;;  %v976_v49 = vsub.f32 %v944_v24, %v1751_v32  ;;  %v1006_v59 = vadd.f32 %v974_v62, %v973_v46  ;;  %v870_v24 = vsub.f32 %v1526_v45, %v1552_v60  ;;  %v1979_v46 = vld [vmem:[#allocation26_spill] sm:$0xff]  ;;  %v1981_v62 = vld [vmem:[#allocation27_spill] sm:$0xff]  ;;  %903 = vst [vmem:[#allocation7 + $0x10] sm:$0xff] %v871_v28  ;;  %908 = vst [vmem:[#allocation7 + $0x38] sm:$0xff] %v876_v57 }
 0x107   :  { %v1208_v10 = vpop.eup %1207  ;;  %v1764_v21 = vmul.f32 0.6931472, %v1206_v31  ;;  %v977_v41 = vsub.f32 %v945_v40, %v1757_v23  ;;  %v872_v54 = vsub.f32 %v1979_v46, %v1559_v50  ;;  %v1980_v40 = vld [vmem:[#allocation31_spill] sm:$0xff]  ;;  %v1983_v31 = vld [vmem:[#allocation28_spill] sm:$0xff]  ;;  %v877_v45 = vsub.f32 %v1726_v37, %v1738_v16  ;;  %910 = vst [vmem:[#allocation7 + $0x48] sm:$0xff] %v878_v63 }
 0x108   :  { %v1007_v30 = vadd.f32 %v1006_v59, %v975_v52  ;;  %v836_v5 = vmul.f32 0.6931472, %v1208_v10  ;;  %v978_v42 = vsub.f32 %v946_v55, %v1760_v25  ;;  %v873_v44 = vsub.f32 %v1981_v62, %v1980_v40  ;;  %v1982_v52 = vld [vmem:[#allocation32_spill] sm:$0xff]  ;;  %v1985_v59 = vld [vmem:[#allocation29_spill] sm:$0xff]  ;;  %902 = vst [vmem:[#allocation7 + $0x8] sm:$0xff] %v870_v24 }
 0x109   :  { %v979_v35 = vsub.f32 %v947_v20, %v1764_v21  ;;  %v874_v55 = vsub.f32 %v1983_v31, %v1982_v52  ;;  %v879_v60 = vsub.f32 %v1730_v11, %v1746_v6  ;;  %v880_v3 = vsub.f32 %v1732_v27, %v1751_v32  ;;  %904 = vst [vmem:[#allocation7 + $0x18] sm:$0xff] %v872_v54  ;;  %v1987_v11 = vld [vmem:[#allocation18_spill] sm:$0xff]  ;;  %v1990_v6 = vld [vmem:[#allocation11_spill] sm:$0xff]  ;;  %v1991_v32 = vld [vmem:[#allocation20_spill] sm:$0xff] }
 0x10a   :  { %v1008_v1 = vadd.f32 %v1007_v30, %v976_v49  ;;  %v980_v0 = vsub.f32 %v948_v13, %v836_v5  ;;  %v1044_v26 = vld [vmem:[%s1900_s3 + $0x10] sm:$0xff]  ;;  %v1984_v49 = vld [vmem:[#allocation33_spill] sm:$0xff]  ;;  %v881_v50 = vsub.f32 %v1735_v2, %v1757_v23  ;;  %v882_v29 = vsub.f32 %v1741_v18, %v1760_v25  ;;  %905 = vst [vmem:[#allocation7 + $0x20] sm:$0xff] %v873_v44  ;;  %v1988_v27 = vld [vmem:[#allocation10_spill] sm:$0xff] }
 0x10b   :  { %v1048_v39 = vadd.f32 %v1044_v26, %v1023_v14  ;;  %v875_v10 = vsub.f32 %v1985_v59, %v1984_v49  ;;  %v883_v37 = vsub.f32 %v1749_v43, %v1764_v21  ;;  %v884_v53 = vsub.f32 %v1755_v22, %v836_v5  ;;  %906 = vst [vmem:[#allocation7 + $0x28] sm:$0xff] %v874_v55  ;;  %v1992_v23 = vld [vmem:[#allocation12_spill] sm:$0xff]  ;;  %v1993_v25 = vld [vmem:[#allocation21_spill] sm:$0xff]  ;;  %v1995_v22 = vld [vmem:[#allocation22_spill] sm:$0xff] }
 0x10c   :  { %v1009_v51 = vadd.f32 %v1008_v1, %v977_v41  ;;  %v885_v16 = vsub.f32 %v1988_v27, %v1987_v11  ;;  %v886_v2 = vsub.f32 %v1990_v6, %v1989_v12  ;;  %v887_v18 = vsub.f32 %v1992_v23, %v1991_v32  ;;  %v1994_v20 = vld [vmem:[#allocation13_spill] sm:$0xff]  ;;  %909 = vst [vmem:[#allocation7 + $0x40] sm:$0xff] %v877_v45  ;;  %v1996_v21 = vld [vmem:[#allocation14_spill] sm:$0xff]  ;;  %v1997_v30 = vld [vmem:[#allocation23_spill] sm:$0xff] }
 0x10d   :  { %1053 = vst.msk [vmem:[%s1900_s3 + $0x10] sm:$0xff] %vm1037_vm0, %v1048_v39  ;;  %907 = vst [vmem:[#allocation7 + $0x30] sm:$0xff] %v875_v10  ;;  %v888_v43 = vsub.f32 %v1994_v20, %v1993_v25  ;;  %v889_v41 = vsub.f32 %v1996_v21, %v1995_v22  ;;  %v1998_v5 = vld [vmem:[#allocation15_spill] sm:$0xff]  ;;  %v2000_v1 = vld [vmem:[#allocation16_spill] sm:$0xff]  ;;  %v896_v14 = vsub.f32 %v1654_v48, %v1684_v47 }
 0x10e   :  { %v1010_v17 = vadd.f32 %v1009_v51, %v978_v42  ;;  %911 = vst [vmem:[#allocation7 + $0x50] sm:$0xff] %v879_v60  ;;  %912 = vst [vmem:[#allocation7 + $0x58] sm:$0xff] %v880_v3  ;;  %v890_v13 = vsub.f32 %v1998_v5, %v1997_v30  ;;  %v1999_v42 = vld [vmem:[#allocation24_spill] sm:$0xff]  ;;  %v2001_v51 = vld [vmem:[#allocation25_spill] sm:$0xff]  ;;  %v900_v48 = vsub.f32 %v2008_v8, %v1696_v9 }
 0x10f   :  { %913 = vst [vmem:[#allocation7 + $0x60] sm:$0xff] %v881_v50  ;;  %914 = vst [vmem:[#allocation7 + $0x68] sm:$0xff] %v882_v29  ;;  %v2003_v26 = vld [vmem:[#allocation34_spill] sm:$0xff] }
 0x110   :  { %v1011_v34 = vadd.f32 %v1010_v17, %v979_v35  ;;  %v891_v35 = vsub.f32 %v2000_v1, %v1999_v42  ;;  %915 = vst [vmem:[#allocation7 + $0x70] sm:$0xff] %v883_v37  ;;  %916 = vst [vmem:[#allocation7 + $0x78] sm:$0xff] %v884_v53  ;;  %v897_v39 = vsub.f32 %v2003_v26, %v1687_v15 }
 0x111   :  { %917 = vst [vmem:[#allocation7 + $0x80] sm:$0xff] %v885_v16  ;;  %918 = vst [vmem:[#allocation7 + $0x88] sm:$0xff] %v886_v2 }
 0x112   :  { %v1012_v7 = vadd.f32 %v1011_v34, %v980_v0  ;;  %v2002_v0 = vld [vmem:[#allocation17_spill] sm:$0xff]  ;;  %v893_v34 = vsub.f32 %v1647_v58, %v1671_v61  ;;  %919 = vst [vmem:[#allocation7 + $0x90] sm:$0xff] %v887_v18  ;;  %920 = vst [vmem:[#allocation7 + $0x98] sm:$0xff] %v888_v43  ;;  %v2005_v58 = vld [vmem:[#allocation35_spill] sm:$0xff] }
 0x113   :  { %v892_v17 = vsub.f32 %v2002_v0, %v2001_v51  ;;  %v898_v61 = vsub.f32 %v2005_v58, %v2004_v4  ;;  %921 = vst [vmem:[#allocation7 + $0xa0] sm:$0xff] %v889_v41  ;;  %922 = vst [vmem:[#allocation7 + $0xa8] sm:$0xff] %v890_v13 }
 0x114   :  { %1013 = vadd.xlane.f32.xlu0 %v1012_v7  ;;  %v894_v7 = vsub.f32 %v1649_v56, %v1675_v38  ;;  %v2006_v56 = vld [vmem:[#allocation39_spill] sm:$0xff]  ;;  %v2007_v38 = vld [vmem:[#allocation36_spill] sm:$0xff]  ;;  %923 = vst [vmem:[#allocation7 + $0xb0] sm:$0xff] %v891_v35  ;;  %925 = vst [vmem:[#allocation7 + $0xc0] sm:$0xff] %v893_v34 }
 0x115   :  { %v899_v36 = vsub.f32 %v2007_v38, %v2006_v56  ;;  %924 = vst [vmem:[#allocation7 + $0xb8] sm:$0xff] %v892_v17  ;;  %928 = vst [vmem:[#allocation7 + $0xd8] sm:$0xff] %v896_v14 }
 0x116   :  { %926 = vst [vmem:[#allocation7 + $0xc8] sm:$0xff] %v894_v7  ;;  %929 = vst [vmem:[#allocation7 + $0xe0] sm:$0xff] %v897_v39 }
 0x117   :  { %930 = vst [vmem:[#allocation7 + $0xe8] sm:$0xff] %v898_v61  ;;  %931 = vst [vmem:[#allocation7 + $0xf0] sm:$0xff] %v899_v36 }
 0x118   :  { %932 = vst [vmem:[#allocation7 + $0xf8] sm:$0xff] %v900_v48 }
 0x119   :  { %1250 = shalt.err (!%p1247_p12)
}
 0x11a   :  { %s1251_s14 = scalar_lea.hbm %s1899_s2, 4096 }
 0x11b   :  { %p1252_p13 = scmp.ne.s32.totalorder %s1899_s2, %s1251_s14  ;;  %p1255_p0 = scmp.lt.u32.totalorder %s1251_s14, %s1899_s2 }
 0x11d   :  { %p1257_p1 = pnand %p1255_p0, %p1252_p13 }
 0x11f   :  { %1260 = shalt.err (!%p1257_p1)
}
 0x120   :  { %s1268_s19 = smov 1024   ;;  %s1269_s20 = smov 64   ;;  %v1042_v47 = vld [vmem:[%s1900_s3] sm:$0xff]  ;;  %v1045_v24 = vld [vmem:[%s1900_s3 + $0x18] sm:$0xff]  ;;  %v1043_v54 = vld [vmem:[%s1900_s3 + $0x8] sm:$0xff] }
 0x121   :  { %1066 = dma.vmem_to_hbm [thread:$0]  %s1849_s10, 4096, %s1899_s2, [#allocation6], %s1268_s19, %s1268_s19, %s1269_s20  }
 0x12f   :  { %v1005_v15 = vpop.xlane.xlu0 %1004 }
 0x130   :  { %v1046_v9 = vadd.f32 %v1042_v47, %v1005_v15 }
 0x132   :  { %1051 = vst.msk [vmem:[%s1900_s3] sm:$0xff] %vm1037_vm0, %v1046_v9 }
 0x168   :  { %v1032_v28 = vpop.xlane.xlu1 %1031 }
 0x169   :  { %v1049_v46 = vadd.f32 %v1045_v24, %v1032_v28 }
 0x16b   :  { %1054 = vst.msk [vmem:[%s1900_s3 + $0x18] sm:$0xff] %vm1037_vm0, %v1049_v46 }
 0x1a1   :  { %v1014_v40 = vpop.xlane.xlu0 %1013 }
 0x1a2   :  { %v1047_v62 = vadd.f32 %v1043_v54, %v1014_v40 }
 0x1a4   :  { %1052 = vst.msk [vmem:[%s1900_s3 + $0x8] sm:$0xff] %vm1037_vm0, %v1047_v62 }
 0x1a5   :  { %1263 = dma.done.wait [#allocation6], 4096  }
 0x1a6   :  { %1264 = vsyncadd [#allocation6], 4294963200 }
 0x1a7   :  { %1074 = vsyncpa [#allocation5], 1 }
 0x1a8   :  { %1075 = vsyncpa [#allocation6], 1 }

</bundles_post_ra>
